<compile_context>
chip_gen: v7x
topology: tpu7x:2x2x1
jax: 0.10.0
libtpu: 0.0.40
codegen_flags: <defaults>
</compile_context>

<pallas_src>
import functools

import jax
import jax.numpy as jnp
from jax.experimental import pallas as pl
from jax.experimental.pallas import tpu as pltpu


# ---------------------------------------------------------------------------
# Kernel
# ---------------------------------------------------------------------------
def mlp_kernel(*refs, relu_flags):
    """refs = (x_ref, w1, b1, w2, b2, ..., o_ref). Whole MLP per batch tile."""
    x_ref = refs[0]
    o_ref = refs[-1]
    wb = refs[1:-1]
    n_layers = len(wb) // 2

    h = x_ref[...]  # f32 activations
    for i in range(n_layers):
        w = wb[2 * i][...]          # bf16 (or f32) weight, shape (in, out)
        b = wb[2 * i + 1][...]      # f32 bias, shape (1, out)
        # Cast only the matmul operands to the weight dtype; accumulate in f32.
        h = jnp.dot(h.astype(w.dtype), w, preferred_element_type=jnp.float32)
        h = h + b                   # bias add in f32 (v5e-friendly)
        if relu_flags[i]:
            h = jnp.maximum(h, 0.0)
    o_ref[...] = h.astype(o_ref.dtype)


# ---------------------------------------------------------------------------
# Host-side wrapper
# ---------------------------------------------------------------------------
def _choose_tile_b(B):
    # Prefer 128/256-row tiles (fill the MXU M dim) while keeping >=2 grid
    # steps when the batch allows it (so both v7x TensorCores are fed).
    for t in (256, 128):
        if B % t == 0 and B // t >= 2:
            return t
    for t in (256, 128, 64, 32, 16, 8):
        if B % t == 0:
            return t
    return B  # tiny/odd batch: single grid step over the full batch


def prepare_params(params_f32, *, fuse_bottleneck=True, weight_dtype=jnp.bfloat16):
    """params_f32: list of 6 (W_t, b), W_t shaped (in, out) in f32.

    Returns (layers, relu_flags) ready for the kernel: weights cast to
    `weight_dtype`, biases kept f32 and reshaped to (1, out), and the
    bottleneck pair (layers 3 & 4, no ReLU between) optionally folded.
    """
    params = list(params_f32)
    relu = [True, True, False, True, True, False]
    if fuse_bottleneck:
        (w3, b3) = params[2]
        (w4, b4) = params[3]
        w34 = w3 @ w4               # (64, 32) @ (32, 64) -> (64, 64), in f32
        b34 = b3 @ w4 + b4
        params = params[:2] + [(w34, b34)] + params[4:]
        relu = [True, True, True, True, False]
    layers = [(w.astype(weight_dtype), b.astype(jnp.float32).reshape(1, -1))
              for (w, b) in params]
    return layers, tuple(relu)


def autoencoder_forward(x, layers, relu_flags, *, tile_b=None):
    """x: (B, D) float32. layers: list of (W_t, b) with W_t shaped (in, out)."""
    B, D = x.shape
    if tile_b is None:
        tile_b = _choose_tile_b(B)
    assert B % tile_b == 0, "batch must be divisible by tile_b"
    grid = (B // tile_b,)

    flat_args = []
    in_specs = [pl.BlockSpec((tile_b, D), lambda i: (i, 0))]
    for (w, b) in layers:
        flat_args.append(w)
        flat_args.append(b)
        # Constant block index -> params stay resident, no per-step re-DMA.
        in_specs.append(pl.BlockSpec(w.shape, lambda i: (0, 0)))
        in_specs.append(pl.BlockSpec(b.shape, lambda i: (0, 0)))

    out_spec = pl.BlockSpec((tile_b, D), lambda i: (i, 0))

    # Explicit VMEM budget: double-buffered in/out activation tiles,
    # resident params (x2 for potential double-buffering), scratch headroom.
    act_bytes = tile_b * max(D, 128) * 4
    param_bytes = sum(w.size * w.dtype.itemsize + b.size * b.dtype.itemsize
                      for (w, b) in layers)
    vmem_est = 2 * (2 * act_bytes) + 2 * param_bytes + 4 * act_bytes
    vmem_limit = int(min(max(2 * vmem_est, 16 * 1024 * 1024), 48 * 1024 * 1024))

    kernel = functools.partial(mlp_kernel, relu_flags=relu_flags)

    return pl.pallas_call(
        kernel,
        out_shape=jax.ShapeDtypeStruct((B, D), x.dtype),
        grid_spec=pltpu.PrefetchScalarGridSpec(
            num_scalar_prefetch=0,
            grid=grid,
            in_specs=in_specs,
            out_specs=out_spec,
        ),
        compiler_params=pltpu.CompilerParams(
            dimension_semantics=("parallel",),
            vmem_limit_bytes=vmem_limit,
        ),
    )(x, *flat_args)


# ---------------------------------------------------------------------------
# Reference & init helpers
# ---------------------------------------------------------------------------
def init_linear(key, fan_in, fan_out):
    """Deterministic init mimicking nn.Linear bounds; W_t is (in, out)."""
    kw, kb = jax.random.split(key)
    bound = 1.0 / jnp.sqrt(fan_in)
    w_t = jax.random.uniform(kw, (fan_in, fan_out), jnp.float32, -bound, bound)
    b = jax.random.uniform(kb, (fan_out,), jnp.float32, -bound, bound)
    return w_t, b


def mlp_reference(x, layers, relu_flags):
    """Plain-JAX reference with the same per-layer numerics as the kernel."""
    h = x
    for (w, b), r in zip(layers, relu_flags):
        h = jnp.dot(h.astype(w.dtype), w, preferred_element_type=jnp.float32)
        h = h + b.reshape(1, -1).astype(jnp.float32)
        if r:
            h = jnp.maximum(h, 0.0)
    return h


# ---------------------------------------------------------------------------
# Demo / correctness check
# ---------------------------------------------------------------------------
if __name__ == "__main__":
    input_size = 256
    batch = 256  # -> tile_b=128, grid=(2,) "parallel": full MXU rows, 2 TC-able

    key = jax.random.PRNGKey(0)
    keys = jax.random.split(key, 7)

    # encoder: input->128->64->32 ; decoder: 32->64->128->input
    dims = [(input_size, 128), (128, 64), (64, 32),
            (32, 64), (64, 128), (128, input_size)]
    params_f32 = [init_linear(keys[i], fi, fo) for i, (fi, fo) in enumerate(dims)]
    x = jax.random.normal(keys[6], (batch, input_size), jnp.float32)

    # Kernel-ready params: bottleneck fold + bf16 weights (f32 biases).
    layers, relu_flags = prepare_params(params_f32)

    out = autoencoder_forward(x, layers, relu_flags)
    out = jax.block_until_ready(out)

    # 1) Exact-numerics reference (same bf16 operands / fused layer / f32 acc).
    matched_ref = mlp_reference(x, layers, relu_flags)
    # 2) Original module semantics in pure f32 (unfused), loose tolerance for
    #    the bf16 matmul operands.
    spec_ref = mlp_reference(x, params_f32, (True, True, False, True, True, False))

    assert out.shape == (batch, input_size)
    assert jnp.allclose(out, matched_ref, atol=1e-4, rtol=1e-4), \
        "mismatch vs matched-numerics reference"
    assert jnp.allclose(out, spec_ref, atol=3e-2, rtol=3e-2), \
        "mismatch vs f32 module reference"

    print("KERNEL_OK")
</pallas_src>

<mosaic_0001>
module attributes {stable_mosaic.version = 11 : i64} {
  func.func @mlp_kernel(%arg0: i32, %arg1: memref<128x256xf32, #tpu.memory_space<vmem>>, %arg2: memref<256x128xbf16, #tpu.memory_space<vmem>>, %arg3: memref<1x128xf32, #tpu.memory_space<vmem>>, %arg4: memref<128x64xbf16, #tpu.memory_space<vmem>>, %arg5: memref<1x64xf32, #tpu.memory_space<vmem>>, %arg6: memref<64x64xbf16, #tpu.memory_space<vmem>>, %arg7: memref<1x64xf32, #tpu.memory_space<vmem>>, %arg8: memref<64x128xbf16, #tpu.memory_space<vmem>>, %arg9: memref<1x128xf32, #tpu.memory_space<vmem>>, %arg10: memref<128x256xbf16, #tpu.memory_space<vmem>>, %arg11: memref<1x256xf32, #tpu.memory_space<vmem>>, %arg12: memref<128x256xf32, #tpu.memory_space<vmem>>) attributes {dimension_semantics = [#tpu.dimension_semantics<parallel>], iteration_bounds = array<i64: 2>, scalar_prefetch = 0 : i64, scratch_operands = 0 : i64, tpu.core_type = #tpu.core_type<tc>, window_params = [{transform_indices = @transform_0, window_bounds = array<i64: 128, 256>}, {pipeline_mode = #tpu.pipeline_mode<synchronous>, transform_indices = @transform_1, window_bounds = array<i64: 256, 128>}, {pipeline_mode = #tpu.pipeline_mode<synchronous>, transform_indices = @transform_2, window_bounds = array<i64: 1, 128>}, {pipeline_mode = #tpu.pipeline_mode<synchronous>, transform_indices = @transform_3, window_bounds = array<i64: 128, 64>}, {pipeline_mode = #tpu.pipeline_mode<synchronous>, transform_indices = @transform_4, window_bounds = array<i64: 1, 64>}, {pipeline_mode = #tpu.pipeline_mode<synchronous>, transform_indices = @transform_5, window_bounds = array<i64: 64, 64>}, {pipeline_mode = #tpu.pipeline_mode<synchronous>, transform_indices = @transform_6, window_bounds = array<i64: 1, 64>}, {pipeline_mode = #tpu.pipeline_mode<synchronous>, transform_indices = @transform_7, window_bounds = array<i64: 64, 128>}, {pipeline_mode = #tpu.pipeline_mode<synchronous>, transform_indices = @transform_8, window_bounds = array<i64: 1, 128>}, {pipeline_mode = #tpu.pipeline_mode<synchronous>, transform_indices = @transform_9, window_bounds = array<i64: 128, 256>}, {pipeline_mode = #tpu.pipeline_mode<synchronous>, transform_indices = @transform_10, window_bounds = array<i64: 1, 256>}, {transform_indices = @transform_11, window_bounds = array<i64: 128, 256>}]} {
    %c0 = arith.constant 0 : index
    %c0_0 = arith.constant 0 : index
    %0 = vector.load %arg1[%c0, %c0_0] : memref<128x256xf32, #tpu.memory_space<vmem>>, vector<128x256xf32>
    %c0_1 = arith.constant 0 : index
    %c0_2 = arith.constant 0 : index
    %1 = vector.load %arg2[%c0_1, %c0_2] : memref<256x128xbf16, #tpu.memory_space<vmem>>, vector<256x128xbf16>
    %c0_3 = arith.constant 0 : index
    %c0_4 = arith.constant 0 : index
    %2 = vector.load %arg3[%c0_3, %c0_4] : memref<1x128xf32, #tpu.memory_space<vmem>>, vector<1x128xf32>
    %3 = arith.truncf %0 : vector<128x256xf32> to vector<128x256xbf16>
    %cst = arith.constant dense<0.000000e+00> : vector<128x128xf32>
    %4 = tpu.matmul %3, %1, %cst {dimension_numbers = #tpu.dot_dimension_numbers<[1], [0], [0], [1], [0, 0, 1, 1], [], []>} : vector<128x256xbf16>, vector<256x128xbf16>, vector<128x128xf32> -> vector<128x128xf32>
    %5 = vector.broadcast %2 : vector<1x128xf32> to vector<128x128xf32>
    %6 = arith.addf %4, %5 : vector<128x128xf32>
    %cst_5 = arith.constant 0.000000e+00 : f32
    %7 = vector.broadcast %cst_5 : f32 to vector<128x128xf32>
    %8 = arith.maximumf %6, %7 : vector<128x128xf32>
    %c0_6 = arith.constant 0 : index
    %c0_7 = arith.constant 0 : index
    %9 = vector.load %arg4[%c0_6, %c0_7] : memref<128x64xbf16, #tpu.memory_space<vmem>>, vector<128x64xbf16>
    %c0_8 = arith.constant 0 : index
    %c0_9 = arith.constant 0 : index
    %10 = vector.load %arg5[%c0_8, %c0_9] : memref<1x64xf32, #tpu.memory_space<vmem>>, vector<1x64xf32>
    %11 = arith.truncf %8 : vector<128x128xf32> to vector<128x128xbf16>
    %cst_10 = arith.constant dense<0.000000e+00> : vector<128x64xf32>
    %12 = tpu.matmul %11, %9, %cst_10 {dimension_numbers = #tpu.dot_dimension_numbers<[1], [0], [0], [1], [0, 0, 1, 1], [], []>} : vector<128x128xbf16>, vector<128x64xbf16>, vector<128x64xf32> -> vector<128x64xf32>
    %13 = vector.broadcast %10 : vector<1x64xf32> to vector<128x64xf32>
    %14 = arith.addf %12, %13 : vector<128x64xf32>
    %cst_11 = arith.constant 0.000000e+00 : f32
    %15 = vector.broadcast %cst_11 : f32 to vector<128x64xf32>
    %16 = arith.maximumf %14, %15 : vector<128x64xf32>
    %c0_12 = arith.constant 0 : index
    %c0_13 = arith.constant 0 : index
    %17 = vector.load %arg6[%c0_12, %c0_13] : memref<64x64xbf16, #tpu.memory_space<vmem>>, vector<64x64xbf16>
    %c0_14 = arith.constant 0 : index
    %c0_15 = arith.constant 0 : index
    %18 = vector.load %arg7[%c0_14, %c0_15] : memref<1x64xf32, #tpu.memory_space<vmem>>, vector<1x64xf32>
    %19 = arith.truncf %16 : vector<128x64xf32> to vector<128x64xbf16>
    %cst_16 = arith.constant dense<0.000000e+00> : vector<128x64xf32>
    %20 = tpu.matmul %19, %17, %cst_16 {dimension_numbers = #tpu.dot_dimension_numbers<[1], [0], [0], [1], [0, 0, 1, 1], [], []>} : vector<128x64xbf16>, vector<64x64xbf16>, vector<128x64xf32> -> vector<128x64xf32>
    %21 = vector.broadcast %18 : vector<1x64xf32> to vector<128x64xf32>
    %22 = arith.addf %20, %21 : vector<128x64xf32>
    %cst_17 = arith.constant 0.000000e+00 : f32
    %23 = vector.broadcast %cst_17 : f32 to vector<128x64xf32>
    %24 = arith.maximumf %22, %23 : vector<128x64xf32>
    %c0_18 = arith.constant 0 : index
    %c0_19 = arith.constant 0 : index
    %25 = vector.load %arg8[%c0_18, %c0_19] : memref<64x128xbf16, #tpu.memory_space<vmem>>, vector<64x128xbf16>
    %c0_20 = arith.constant 0 : index
    %c0_21 = arith.constant 0 : index
    %26 = vector.load %arg9[%c0_20, %c0_21] : memref<1x128xf32, #tpu.memory_space<vmem>>, vector<1x128xf32>
    %27 = arith.truncf %24 : vector<128x64xf32> to vector<128x64xbf16>
    %cst_22 = arith.constant dense<0.000000e+00> : vector<128x128xf32>
    %28 = tpu.matmul %27, %25, %cst_22 {dimension_numbers = #tpu.dot_dimension_numbers<[1], [0], [0], [1], [0, 0, 1, 1], [], []>} : vector<128x64xbf16>, vector<64x128xbf16>, vector<128x128xf32> -> vector<128x128xf32>
    %29 = vector.broadcast %26 : vector<1x128xf32> to vector<128x128xf32>
    %30 = arith.addf %28, %29 : vector<128x128xf32>
    %cst_23 = arith.constant 0.000000e+00 : f32
    %31 = vector.broadcast %cst_23 : f32 to vector<128x128xf32>
    %32 = arith.maximumf %30, %31 : vector<128x128xf32>
    %c0_24 = arith.constant 0 : index
    %c0_25 = arith.constant 0 : index
    %33 = vector.load %arg10[%c0_24, %c0_25] : memref<128x256xbf16, #tpu.memory_space<vmem>>, vector<128x256xbf16>
    %c0_26 = arith.constant 0 : index
    %c0_27 = arith.constant 0 : index
    %34 = vector.load %arg11[%c0_26, %c0_27] : memref<1x256xf32, #tpu.memory_space<vmem>>, vector<1x256xf32>
    %35 = arith.truncf %32 : vector<128x128xf32> to vector<128x128xbf16>
    %cst_28 = arith.constant dense<0.000000e+00> : vector<128x256xf32>
    %36 = tpu.matmul %35, %33, %cst_28 {dimension_numbers = #tpu.dot_dimension_numbers<[1], [0], [0], [1], [0, 0, 1, 1], [], []>} : vector<128x128xbf16>, vector<128x256xbf16>, vector<128x256xf32> -> vector<128x256xf32>
    %37 = vector.broadcast %34 : vector<1x256xf32> to vector<128x256xf32>
    %38 = arith.addf %36, %37 : vector<128x256xf32>
    %c0_29 = arith.constant 0 : index
    %c0_30 = arith.constant 0 : index
    %39 = vector.load %arg12[%c0_29, %c0_30] : memref<128x256xf32, #tpu.memory_space<vmem>>, vector<128x256xf32>
    tpu.vector_store %arg12[%c0_29, %c0_30], %38 {strides = array<i32>} : memref<128x256xf32, #tpu.memory_space<vmem>>, vector<128x256xf32>,
    return
  }
  func.func @transform_0(%arg0: i32) -> (i32, i32) {
    %c0_i32 = arith.constant 0 : i32
    %c0_i32_0 = arith.constant 0 : i32
    return %arg0, %c0_i32 : i32, i32
  }
  func.func @transform_1(%arg0: i32) -> (i32, i32) {
    %c0_i32 = arith.constant 0 : i32
    %c0_i32_0 = arith.constant 0 : i32
    %c0_i32_1 = arith.constant 0 : i32
    return %c0_i32, %c0_i32_0 : i32, i32
  }
  func.func @transform_2(%arg0: i32) -> (i32, i32) {
    %c0_i32 = arith.constant 0 : i32
    %c0_i32_0 = arith.constant 0 : i32
    %c0_i32_1 = arith.constant 0 : i32
    return %c0_i32, %c0_i32_0 : i32, i32
  }
  func.func @transform_3(%arg0: i32) -> (i32, i32) {
    %c0_i32 = arith.constant 0 : i32
    %c0_i32_0 = arith.constant 0 : i32
    %c0_i32_1 = arith.constant 0 : i32
    return %c0_i32, %c0_i32_0 : i32, i32
  }
  func.func @transform_4(%arg0: i32) -> (i32, i32) {
    %c0_i32 = arith.constant 0 : i32
    %c0_i32_0 = arith.constant 0 : i32
    %c0_i32_1 = arith.constant 0 : i32
    return %c0_i32, %c0_i32_0 : i32, i32
  }
  func.func @transform_5(%arg0: i32) -> (i32, i32) {
    %c0_i32 = arith.constant 0 : i32
    %c0_i32_0 = arith.constant 0 : i32
    %c0_i32_1 = arith.constant 0 : i32
    return %c0_i32, %c0_i32_0 : i32, i32
  }
  func.func @transform_6(%arg0: i32) -> (i32, i32) {
    %c0_i32 = arith.constant 0 : i32
    %c0_i32_0 = arith.constant 0 : i32
    %c0_i32_1 = arith.constant 0 : i32
    return %c0_i32, %c0_i32_0 : i32, i32
  }
  func.func @transform_7(%arg0: i32) -> (i32, i32) {
    %c0_i32 = arith.constant 0 : i32
    %c0_i32_0 = arith.constant 0 : i32
    %c0_i32_1 = arith.constant 0 : i32
    return %c0_i32, %c0_i32_0 : i32, i32
  }
  func.func @transform_8(%arg0: i32) -> (i32, i32) {
    %c0_i32 = arith.constant 0 : i32
    %c0_i32_0 = arith.constant 0 : i32
    %c0_i32_1 = arith.constant 0 : i32
    return %c0_i32, %c0_i32_0 : i32, i32
  }
  func.func @transform_9(%arg0: i32) -> (i32, i32) {
    %c0_i32 = arith.constant 0 : i32
    %c0_i32_0 = arith.constant 0 : i32
    %c0_i32_1 = arith.constant 0 : i32
    return %c0_i32, %c0_i32_0 : i32, i32
  }
  func.func @transform_10(%arg0: i32) -> (i32, i32) {
    %c0_i32 = arith.constant 0 : i32
    %c0_i32_0 = arith.constant 0 : i32
    %c0_i32_1 = arith.constant 0 : i32
    return %c0_i32, %c0_i32_0 : i32, i32
  }
  func.func @transform_11(%arg0: i32) -> (i32, i32) {
    %c0_i32 = arith.constant 0 : i32
    %c0_i32_0 = arith.constant 0 : i32
    return %arg0, %c0_i32 : i32, i32
  }
}

</mosaic_0001>

<bundles_post_ra>
// kernel: tpu_custom_call.1
= control target key start
LH: loop header
LB: loop body
LE: loop exit
PB: predicated region body
PF: predicated region fallthrough
CT: control target
= control target key end

     0   :  { %s3226_s0 = inlined_call_operand.hbm [shape: f32[256,256], index: 0, kind: input, shape index: {}]   ;;  %s3227_s1 = inlined_call_operand.hbm [shape: bf16[256,128], index: 1, kind: input, shape index: {}]   ;;  %s3228_s2 = inlined_call_operand.hbm [shape: f32[1,128], index: 2, kind: input, shape index: {}]   ;;  %s3229_s3 = inlined_call_operand.vmem [shape: bf16[128,64], index: 3, kind: input, shape index: {}]   ;;  %s3230_s4 = inlined_call_operand.hbm [shape: f32[1,64], index: 4, kind: input, shape index: {}]   ;;  %s3231_s5 = inlined_call_operand.hbm [shape: bf16[64,64], index: 5, kind: input, shape index: {}]   ;;  %s3232_s6 = inlined_call_operand.hbm [shape: f32[1,64], index: 6, kind: input, shape index: {}]   ;;  %s3233_s7 = inlined_call_operand.hbm [shape: bf16[64,128], index: 7, kind: input, shape index: {}]   ;;  %s3234_s8 = inlined_call_operand.hbm [shape: f32[1,128], index: 8, kind: input, shape index: {}]   ;;  %s3235_s9 = inlined_call_operand.vmem [shape: bf16[128,256], index: 9, kind: input, shape index: {}]   ;;  %s3236_s10 = inlined_call_operand.vmem [shape: f32[1,256], index: 10, kind: input, shape index: {}]   ;;  %s3237_s11 = inlined_call_operand.hbm [shape: f32[256,256], index: 11, kind: output, shape index: {}]  }
   0x1   :  { %3245 = sst [smem:[#allocation23_spill]] %s3227_s1 }
   0x2   :  { %3246 = sst [smem:[#allocation24_spill]] %s3235_s9 }
   0x3   :  { %3247 = sst [smem:[#allocation25_spill]] %s3236_s10 }
   0x4   :  { %3248 = sst [smem:[#allocation26_spill]] %s3237_s11 }
   0x5   :  { %16 = vsyncpa [#allocation3], 0 }
   0x6   :  { %18 = vsyncpa [#allocation3 + $0x1], 0 }
   0x7   :  { %19 = vsyncpa [#allocation6], 0 }
   0x8   :  { %20 = vsyncpa [#allocation9], 0 }
   0x9   :  { %21 = vsyncpa [#allocation12], 0 }
   0xa   :  { %22 = vsyncpa [#allocation15], 0 }
   0xb   :  { %23 = vsyncpa [#allocation4], 0 }
   0xc   :  { %25 = vsyncpa [#allocation4 + $0x1], 0  ;;  %s2644_s17 = smov 0   ;;  %s2646_s18 = smov 0  }
   0xd   :  { %s2648_s19 = smov 0   ;;  %s2650_s20 = smov 0  }
   0xe LB: > { %s2568_s21 = smov [#allocation5]   ;;  %s2665_s23 = sadd.s32 4294967295, %s2566_s20   ;;  %s2566_s20 = sphi %s2650_s20, %s3277_s20   ;;  %s2562_s19 = sphi %s2648_s19, %s3276_s19   ;;  %s2558_s18 = sphi %s2646_s18, %s3275_s18   ;;  %s2554_s17 = sphi %s2644_s17, %s3274_s17  }
   0xf   : > { %s310_s22 = sshll.u32 %s2568_s21, 4  ;;  %p1777_p0 = scmp.ge.s32.totalorder %s2566_s20, 1  ;;  %s2670_s22 = int_to_ptr.vmem [resolvable:$true] %s310_s22 }
  0x10   : > { %p3242_p1 = scmp.eq.s32.totalorder %s2665_s23, 0  ;;  %p298_p2 = scmp.lt.s32.totalorder %s2566_s20, 3 }
  0x11   : > { %s2569_s25 = smov [#allocation8]   ;;  %s2570_s28 = smov [#allocation11]  }
  0x12   : > { %p2672_p3 = pnand %p1777_p0, %p298_p2  ;;  %s338_s26 = sshll.u32 %s2569_s25, 4  ;;  %s2685_s26 = int_to_ptr.vmem [resolvable:$true] %s338_s26 }
  0x13   : > { %s362_s29 = sshll.u32 %s2570_s28, 4  ;;  %s3251_s1 = sld [smem:[#allocation23_spill]]  ;;  %s2687_s29 = int_to_ptr.vmem [resolvable:$true] %s362_s29 }
  0x14   : > { %s3249_s24 = scalar_select %p2672_p3, 1, 0 }
  0x15   : > { %p2110_p5 = pneg %p2672_p3 }
  0x17   : > { %p2681_p6 = pnand %p2110_p5, %p3242_p1 }
  0x19   : > { %s2258_s13 = scalar_lea.hbm %s3251_s1, 2048  ;;  %p2697_p8 = pneg %p2681_p6 }
  0x1a   : > { %p2259_p7 = scmp.ne.s32.totalorder %s3251_s1, %s2258_s13  ;;  %p2265_p11 = scmp.lt.u32.totalorder %s2258_s13, %s3251_s1 }
  0x1c   : > { %p2261_p9 = pnand %p2697_p8, %p2259_p7 }
  0x1e   : > { %p2262_p10 = pneg %p2261_p9 }
  0x20   : > { %p2267_p12 = pnand %p2265_p11, %p2262_p10 }
  0x22   : > { %2270 = shalt.err (!%p2267_p12)
}
  0x23   : > { %s2271_s28 = scalar_lea.vmem %s2670_s22, 2048  ;;  %p2279_p5 = scmp.lt.s32.totalorder %s2670_s22, %s2670_s22 }
  0x24   : > { %p2272_p13 = scmp.ne.s32.totalorder %s2670_s22, %s2271_s28  ;;  %p2280_p4 = scmp.lt.s32.totalorder %s2271_s28, %s2271_s28 }
  0x26   : > { %p2274_p0 = pnand %p2272_p13, %p2697_p8  ;;  %p2281_p7 = por %p2280_p4, %p2279_p5 }
  0x28   : > { %p2275_p2 = pneg %p2274_p0 }
  0x2a   : > { %p2282_p9 = pnand %p2281_p7, %p2275_p2 }
  0x2c   : > { %2285 = shalt.err (!%p2282_p9)
}
  0x2d   : > { %s3240_s30 = smov 64   ;;  %s2572_s12 = smov 4  }
  0x2e   : > { %2113 = dma.hbm_to_vmem [thread:$0]  (!%p2681_p6), %s3251_s1, 2048, %s2670_s22, [#allocation6], %s3240_s30, %s3240_s30, %s2572_s12  }
  0x2f   : > { %s2286_s25 = scalar_lea.hbm %s3230_s4, 16 }
  0x30   : > { %p2287_p4 = scmp.ne.s32.totalorder %s3230_s4, %s2286_s25  ;;  %p2293_p12 = scmp.lt.u32.totalorder %s2286_s25, %s3230_s4 }
  0x32   : > { %p2289_p10 = pnand %p2287_p4, %p2697_p8 }
  0x34   : > { %p2290_p11 = pneg %p2289_p10 }
  0x36   : > { %p2295_p13 = pnand %p2293_p12, %p2290_p11 }
  0x38   : > { %2298 = shalt.err (!%p2295_p13)
}
  0x39   : > { %s2299_s22 = scalar_lea.vmem %s2685_s26, 16  ;;  %s2306_s11 = scalar_lea.vmem %s2685_s26, 32 }
  0x3a   : > { %p2300_p0 = scmp.ne.s32.totalorder %s2685_s26, %s2299_s22  ;;  %p2307_p7 = scmp.lt.s32.totalorder %s2685_s26, %s2685_s26 }
  0x3b   : > { %p2308_p9 = scmp.lt.s32.totalorder %s2306_s11, %s2299_s22 }
  0x3c   : > { %p2302_p2 = pnand %p2300_p0, %p2697_p8 }
  0x3d   : > { %p2309_p4 = por %p2308_p9, %p2307_p7 }
  0x3e   : > { %p2303_p5 = pneg %p2302_p2 }
  0x40   : > { %p2310_p10 = pnand %p2309_p4, %p2303_p5 }
  0x42   : > { %2313 = shalt.err (!%p2310_p10)
}
  0x43   : > { %2119 = dma.hbm_to_vmem [thread:$0]  (!%p2681_p6), %s3230_s4, 16, %s2685_s26, [#allocation9]  }
  0x44   : > { %s2314_s15 = scalar_lea.hbm %s3232_s6, 16 }
  0x45   : > { %p2315_p11 = scmp.ne.s32.totalorder %s3232_s6, %s2314_s15  ;;  %p2321_p0 = scmp.lt.u32.totalorder %s2314_s15, %s3232_s6 }
  0x47   : > { %p2317_p12 = pnand %p2315_p11, %p2697_p8 }
  0x49   : > { %p2318_p13 = pneg %p2317_p12 }
  0x4b   : > { %p2323_p2 = pnand %p2321_p0, %p2318_p13 }
  0x4d   : > { %2326 = shalt.err (!%p2323_p2)
}
  0x4e   : > { %s2327_s26 = scalar_lea.vmem %s2687_s29, 16  ;;  %s2334_s11 = scalar_lea.vmem %s2687_s29, 32 }
  0x4f   : > { %p2328_p5 = scmp.ne.s32.totalorder %s2687_s29, %s2327_s26  ;;  %p2335_p4 = scmp.lt.s32.totalorder %s2687_s29, %s2687_s29 }
  0x50   : > { %p2336_p10 = scmp.lt.s32.totalorder %s2334_s11, %s2327_s26 }
  0x51   : > { %p2330_p7 = pnand %p2328_p5, %p2697_p8 }
  0x52   : > { %p2337_p11 = por %p2336_p10, %p2335_p4 }
  0x53   : > { %p2331_p9 = pneg %p2330_p7 }
  0x55   : > { %p2338_p12 = pnand %p2337_p11, %p2331_p9 }
  0x57   : > { %2341 = shalt.err (!%p2338_p12)
}
  0x58   : > { %2125 = dma.hbm_to_vmem [thread:$0]  (!%p2681_p6), %s3232_s6, 16, %s2687_s29, [#allocation12]  }
  0x59   : > { %s2573_s13 = smov [#allocation7]   ;;  %s2574_s15 = smov [#allocation10]  }
  0x5a   : > { %s324_s14 = sshll.u32 %s2573_s13, 4  ;;  %s348_s21 = sshll.u32 %s2574_s15, 4  ;;  %s325_s14 = int_to_ptr.vmem [resolvable:$true] %s324_s14  ;;  %s349_s21 = int_to_ptr.vmem [resolvable:$true] %s348_s21 }
  0x5b   : > { %s2342_s22 = scalar_lea.hbm %s3228_s2, 16 }
  0x5c   : > { %p2343_p13 = scmp.ne.s32.totalorder %s3228_s2, %s2342_s22  ;;  %p2349_p5 = scmp.lt.u32.totalorder %s2342_s22, %s3228_s2 }
  0x5e   : > { %p2345_p0 = pnand %p2343_p13, %p2697_p8 }
  0x60   : > { %p2346_p2 = pneg %p2345_p0 }
  0x62   : > { %p2351_p7 = pnand %p2349_p5, %p2346_p2 }
  0x64   : > { %2354 = shalt.err (!%p2351_p7)
}
  0x65   : > { %s2355_s29 = scalar_lea.vmem %s325_s14, 16  ;;  %s2362_s10 = scalar_lea.vmem %s325_s14, 32 }
  0x66   : > { %p2356_p9 = scmp.ne.s32.totalorder %s325_s14, %s2355_s29  ;;  %p2363_p11 = scmp.lt.s32.totalorder %s325_s14, %s325_s14 }
  0x67   : > { %p2364_p12 = scmp.lt.s32.totalorder %s2362_s10, %s2355_s29 }
  0x68   : > { %p2358_p4 = pnand %p2356_p9, %p2697_p8 }
  0x69   : > { %p2365_p1 = por %p2364_p12, %p2363_p11 }
  0x6a   : > { %p2359_p10 = pneg %p2358_p4 }
  0x6c   : > { %p2366_p3 = pnand %p2365_p1, %p2359_p10 }
  0x6e   : > { %2369 = shalt.err (!%p2366_p3)
}
  0x6f   : > { %2116 = dma.hbm_to_vmem [thread:$0]  (!%p2681_p6), %s3228_s2, 16, %s325_s14, [#allocation6]  }
  0x70   : > { %s2370_s28 = scalar_lea.hbm %s3231_s5, 512 }
  0x71   : > { %p2371_p13 = scmp.ne.s32.totalorder %s3231_s5, %s2370_s28  ;;  %p2377_p3 = scmp.lt.u32.totalorder %s2370_s28, %s3231_s5 }
  0x73   : > { %p2373_p0 = pnand %p2371_p13, %p2697_p8 }
  0x75   : > { %p2374_p1 = pneg %p2373_p0 }
  0x77   : > { %p2379_p2 = pnand %p2377_p3, %p2374_p1 }
  0x79   : > { %2382 = shalt.err (!%p2379_p2)
}
  0x7a   : > { %s2383_s29 = scalar_lea.vmem %s349_s21, 512  ;;  %p2391_p4 = scmp.lt.s32.totalorder %s349_s21, %s349_s21 }
  0x7b   : > { %p2384_p5 = scmp.ne.s32.totalorder %s349_s21, %s2383_s29  ;;  %p2392_p10 = scmp.lt.s32.totalorder %s2383_s29, %s2383_s29 }
  0x7d   : > { %p2386_p7 = pnand %p2384_p5, %p2697_p8  ;;  %p2393_p11 = por %p2392_p10, %p2391_p4 }
  0x7f   : > { %p2387_p9 = pneg %p2386_p7 }
  0x81   : > { %p2394_p12 = pnand %p2393_p11, %p2387_p9 }
  0x83   : > { %2397 = shalt.err (!%p2394_p12)
}
  0x84   : > { %s3253_s14 = smov 64   ;;  %s2575_s15 = smov [#allocation13]  }
  0x85   : > { %2122 = dma.hbm_to_vmem [thread:$0]  (!%p2681_p6), %s3231_s5, 512, %s349_s21, [#allocation9], %s3253_s14, %s3253_s14, %s2572_s12  }
  0x86   : > { %s372_s30 = sshll.u32 %s2575_s15, 4  ;;  %s2576_s25 = smov [#allocation14]   ;;  %s373_s30 = int_to_ptr.vmem [resolvable:$true] %s372_s30 }
  0x87   : > { %s386_s28 = sshll.u32 %s2576_s25, 4  ;;  %s2398_s11 = scalar_lea.hbm %s3233_s7, 512  ;;  %s387_s28 = int_to_ptr.vmem [resolvable:$true] %s386_s28 }
  0x88   : > { %p2399_p13 = scmp.ne.s32.totalorder %s3233_s7, %s2398_s11  ;;  %p2405_p3 = scmp.lt.u32.totalorder %s2398_s11, %s3233_s7 }
  0x8a   : > { %p2401_p0 = pnand %p2399_p13, %p2697_p8 }
  0x8c   : > { %p2402_p1 = pneg %p2401_p0 }
  0x8e   : > { %p2407_p2 = pnand %p2405_p3, %p2402_p1 }
  0x90   : > { %2410 = shalt.err (!%p2407_p2)
}
  0x91   : > { %s2411_s21 = scalar_lea.vmem %s373_s30, 512  ;;  %p2419_p4 = scmp.lt.s32.totalorder %s373_s30, %s373_s30 }
  0x92   : > { %p2412_p5 = scmp.ne.s32.totalorder %s373_s30, %s2411_s21  ;;  %p2420_p10 = scmp.lt.s32.totalorder %s2411_s21, %s2411_s21 }
  0x94   : > { %p2414_p7 = pnand %p2412_p5, %p2697_p8  ;;  %p2421_p11 = por %p2420_p10, %p2419_p4 }
  0x96   : > { %p2415_p9 = pneg %p2414_p7 }
  0x98   : > { %p2422_p12 = pnand %p2421_p11, %p2415_p9 }
  0x9a   : > { %2425 = shalt.err (!%p2422_p12)
}
  0x9b   : > { %2128 = dma.hbm_to_vmem [thread:$0]  (!%p2681_p6), %s3233_s7, 512, %s373_s30, [#allocation12], %s3253_s14, %s3253_s14, %s2572_s12  }
  0x9c   : > { %s2426_s22 = scalar_lea.hbm %s3234_s8, 16 }
  0x9d   : > { %p2427_p13 = scmp.ne.s32.totalorder %s3234_s8, %s2426_s22  ;;  %p2433_p3 = scmp.lt.u32.totalorder %s2426_s22, %s3234_s8 }
  0x9f   : > { %p2429_p0 = pnand %p2427_p13, %p2697_p8 }
  0xa1   : > { %p2430_p1 = pneg %p2429_p0 }
  0xa3   : > { %p2435_p2 = pnand %p2433_p3, %p2430_p1 }
  0xa5   : > { %2438 = shalt.err (!%p2435_p2)
}
  0xa6   : > { %s2439_s10 = scalar_lea.vmem %s387_s28, 16  ;;  %s2446_s12 = scalar_lea.vmem %s387_s28, 32 }
  0xa7   : > { %p2440_p5 = scmp.ne.s32.totalorder %s387_s28, %s2439_s10  ;;  %p2447_p4 = scmp.lt.s32.totalorder %s387_s28, %s387_s28 }
  0xa8   : > { %p2448_p10 = scmp.lt.s32.totalorder %s2446_s12, %s2439_s10 }
  0xa9   : > { %p2442_p7 = pnand %p2440_p5, %p2697_p8 }
  0xaa   : > { %p2449_p11 = por %p2448_p10, %p2447_p4 }
  0xab   : > { %p2443_p9 = pneg %p2442_p7 }
  0xad   : > { %p2450_p12 = pnand %p2449_p11, %p2443_p9 }
  0xaf   : > { %2453 = shalt.err (!%p2450_p12)
}
  0xb0   : > { %2131 = dma.hbm_to_vmem [thread:$0]  (!%p2681_p6), %s3234_s8, 16, %s387_s28, [#allocation15]  }
  0xb1   : > { %s1776_s16 = sadd.s32 4294967294, %s2566_s20   ;;  %s2849_s27 = sadd.s32 1, %s2566_s20  }
  0xb2   : > { %s38_s21 = sadd.s32 1, %s2562_s19  ;;  %s35_s1 = ssub.s32 %s2566_s20, %s2849_s27 }
  0xb3   : > { %p45_p8 = scmp.ne.s32.totalorder %s2562_s19, %s2558_s18  ;;  %p36_p13 = scmp.eq.s32.totalorder %s35_s1, 0 }
  0xb4   : > { %p46_p0 = scmp.eq.s32.totalorder %s2566_s20, 0  ;;  %p51_p1 = scmp.ne.s32.totalorder %s2558_s18, %s2554_s17 }
  0xb5   : > { %p285_p3 = scmp.eq.s32.totalorder %s2665_s23, 1  ;;  %p3254_p5 = scmp.eq.s32.totalorder %s2665_s23, 0 }
  0xb6   : > { %s2861_s13 = scalar_select %p36_p13, %s2562_s19, %s38_s21  }
  0xb7   : > { %p47_p2 = por %p46_p0, %p45_p8  ;;  %p2865_p7 = por %p3254_p5, %p51_p1 }
  0xb8   : > { %p2869_p6 = por %p285_p3, %p45_p8  ;;  %p291_p9 = scmp.eq.s32.totalorder %s1776_s16, 1 }
  0xb9   : > { %p2147_p4 = scmp.lt.s32.totalorder %s2566_s20, 2  ;;  %s403_s25 = sand.u32 1, %s2562_s19  }
  0xba   : > { %s3256_s28 = scalar_select %p2869_p6, 1, 0 }
  0xbb   : > { %p2875_p10 = por %p291_p9, %p51_p1  ;;  %s1786_s26 = sshll.u32 %s403_s25, 8 }
  0xbc   : > { %s1875_s11 = sshll.u32 %s2566_s20, 12  ;;  %s407_s12 = scalar_lea.vmem [#allocation2], %s1786_s26 }
  0xbd   : > { %s3257_s22 = scalar_select %p2875_p10, 1, 0 }
  0xbe   : > { %s2883_s10 = scalar_lea.hbm %s3226_s0, %s1875_s11  ;;  %s415_s14 = sshll.u32 %s407_s12, 4  ;;  %s2889_s14 = int_to_ptr.vmem [resolvable:$true] %s415_s14 }
  0xbf   : > { %p2885_p11 = pnand %p2147_p4, %p47_p2  ;;  %s2891_s16 = scalar_lea.sflag [#allocation3], %s403_s25 }
  0xc0   : > { %s2454_s21 = scalar_lea.hbm %s2883_s10, 4096  ;;  %s2459_s11 = scalar_lea.hbm %s3226_s0, 8192 }
  0xc1   : > { %p2455_p12 = scmp.ne.s32.totalorder %s2883_s10, %s2454_s21  ;;  %p2456_p8 = pneg %p2885_p11 }
  0xc2   : > { %p2460_p1 = scmp.lt.u32.totalorder %s2883_s10, %s3226_s0  ;;  %p2461_p3 = scmp.lt.u32.totalorder %s2459_s11, %s2454_s21 }
  0xc3   : > { %p2457_p13 = pnand %p2456_p8, %p2455_p12  ;;  %p2463_p5 = scmp.lt.u32.totalorder %s2454_s21, %s2883_s10 }
  0xc4   : > { %p2462_p2 = por %p2461_p3, %p2460_p1 }
  0xc5   : > { %p2458_p0 = pneg %p2457_p13 }
  0xc6   : > { %p2464_p9 = por %p2463_p5, %p2462_p2 }
  0xc8   : > { %p2465_p4 = pnand %p2464_p9, %p2458_p0 }
  0xca   : > { %2468 = shalt.err (!%p2465_p4)
}
  0xcb   : > { %s2469_s25 = scalar_lea.vmem %s2889_s14, 4096  ;;  %s2577_s12 = smov [#allocation2]  }
  0xcc   : > { %p2470_p12 = scmp.ne.s32.totalorder %s2889_s14, %s2469_s25  ;;  %s2474_s1 = sshll.u32 %s2577_s12, 4  ;;  %s2475_s1 = int_to_ptr.vmem [resolvable:$false] %s2474_s1 }
  0xcd   : > { %s2476_s26 = scalar_lea.vmem %s2475_s1, 8192  ;;  %p2477_p6 = scmp.lt.s32.totalorder %s2889_s14, %s2475_s1 }
  0xce   : > { %p2472_p13 = pnand %p2470_p12, %p2456_p8  ;;  %p2478_p1 = scmp.lt.s32.totalorder %s2476_s26, %s2469_s25 }
  0xd0   : > { %p2473_p10 = pneg %p2472_p13  ;;  %p2479_p3 = por %p2478_p1, %p2477_p6 }
  0xd2   : > { %p2480_p2 = pnand %p2479_p3, %p2473_p10 }
  0xd4   : > { %2483 = shalt.err (!%p2480_p2)
}
  0xd5   : > { %s2578_s21 = smov 256   ;;  %s2579_s11 = smov 16  }
  0xd6   : > { %2135 = dma.hbm_to_vmem [thread:$0]  (!%p2885_p11), %s2883_s10, 4096, %s2889_s14, %s2891_s16, %s2578_s21, %s2578_s21, %s2579_s11  }
  0xd7   : > { %p3259_p8 = scmp.ne.s32.totalorder %s3249_s24, 0 }
  0xd8   : > { %s2922_s9 = sand.u32 (!%p3259_p8), 1, %s2558_s18  }
  0xd9   : > { %427 = sbr.rel (%p3259_p8) target bundleno = 1455 (0x5af), region = 64  ;;  %s1791_s29 = sshll.u32 (!%p3259_p8), %s2922_s9, 8 }
  0xda   : > { %s430_s25 = scalar_lea.sflag (!%p3259_p8), [#allocation3], %s2922_s9  ;;  %s2928_s12 = scalar_lea.vmem (!%p3259_p8), [#allocation2], %s1791_s29 }
  0xe0   : > { %2529 = dma.done.wait (%p2865_p7), %s430_s25, 4096  }
  0xe1   : > { %2531 = vsyncadd (%p2865_p7), %s430_s25, 4294963200  ;;  %p3260_p6 = scmp.eq.s32.totalorder %s2665_s23, 0 }
  0xe3   : > { %2533 = dma.done.wait (%p3260_p6), [#allocation6], 2064   ;;  %p3261_p10 = pmov %p3260_p6 }
  0xe4   : > { %p3262_p11 = pmov %p3260_p6 }
  0xe5   : > { %2535 = vsyncadd (%p3261_p10), [#allocation6], 4294965232 }
  0xe6   : > { %2537 = dma.done.wait (%p3262_p11), [#allocation9], 528   ;;  %p3263_p0 = pmov %p3260_p6 }
  0xe8   : > { %2539 = vsyncadd (%p3263_p0), [#allocation9], 4294966768  ;;  %p3264_p5 = pmov %p3263_p0 }
  0xe9   : > { %p3265_p9 = pmov %p3263_p0 }
  0xea   : > { %2541 = dma.done.wait (%p3264_p5), [#allocation12], 528  }
  0xeb   : > { %2543 = vsyncadd (%p3265_p9), [#allocation12], 4294966768  ;;  %p3266_p7 = pmov %p3263_p0 }
  0xec   : > { %p3267_p4 = pmov %p3263_p0 }
  0xed   : > { %2545 = dma.done.wait (%p3266_p7), [#allocation15], 16  }
  0xee   : > { %2547 = vsyncadd (%p3267_p4), [#allocation15], 4294967280  ;;  %v2202_v0 = vld [vmem:[#allocation5 + $0x40] sm:$0xff]   ;;  %v2204_v2 = vld [vmem:[#allocation5 + $0x48] sm:$0xff]   ;;  %vm1038_vm0 = vcmask 523264   ;;  %s3268_s1 = sld [smem:[#allocation24_spill]] }
  0xef   : > { %v2203_v1 = vld [vmem:[#allocation5] sm:$0xff]   ;;  %1878 = vmatprep.subr.bf16.mxu0 %v2202_v0  ;;  %v2205_v3 = vld [vmem:[#allocation5 + $0x8] sm:$0xff]   ;;  %v2206_v4 = vld [vmem:[#allocation5 + $0x50] sm:$0xff]   ;;  %s3269_s16 = sld [smem:[#allocation25_spill]]  ;;  %s3111_s26 = scalar_lea.vmem [#allocation16], %s1791_s29 }
  0xf0   : > { %1879 = vmatpush3.bf16.msra.mxu0 %v2203_v1  ;;  %v2207_v5 = vld [vmem:[#allocation5 + $0x10] sm:$0xff]   ;;  %v2208_v6 = vld [vmem:[#allocation5 + $0x58] sm:$0xff]   ;;  %v2210_v8 = vld [vmem:[#allocation5 + $0x60] sm:$0xff]   ;;  %s1877_s29 = sshll.u32 %s2665_s23, 12  ;;  %s1636_s21 = sshll.u32 %s3111_s26, 4  ;;  %s3178_s21 = int_to_ptr.vmem [resolvable:$true] %s1636_s21 }
  0xf1   : > { %1880 = vmatprep.subr.bf16.mxu0 %v2204_v2  ;;  %v2209_v7 = vld [vmem:[#allocation5 + $0x18] sm:$0xff]   ;;  %v2211_v9 = vld [vmem:[#allocation5 + $0x20] sm:$0xff]   ;;  %v2212_v10 = vld [vmem:[#allocation5 + $0x68] sm:$0xff]   ;;  %s3270_s24 = sld [smem:[#allocation26_spill]]  ;;  %s1622_s23 = scalar_lea.sflag [#allocation4], %s2922_s9 }
  0xf2   : > { %v504_v11 = vld [vmem:[%s2928_s12 + $0x8] sm:$0xff]  ;;  %v506_v12 = vld [vmem:[%s2928_s12 + $0x18] sm:$0xff]  ;;  %v2214_v15 = vld [vmem:[#allocation5 + $0x70] sm:$0xff]   ;;  %s2484_s10 = scalar_lea.vmem %s3178_s21, 4096  ;;  %p3271_p13 = scmp.ne.s32.totalorder %s3256_s28, 0 }
  0xf3   : > { %v569_v13 = vpack.c.bf16 %v506_v12, %v504_v11  ;;  %v2213_v14 = vld [vmem:[#allocation5 + $0x28] sm:$0xff]   ;;  %v2215_v16 = vld [vmem:[#allocation5 + $0x30] sm:$0xff]   ;;  %v2216_v17 = vld [vmem:[#allocation5 + $0x78] sm:$0xff]   ;;  %p2485_p12 = scmp.ne.s32.totalorder %s3178_s21, %s2484_s10  ;;  %s2581_s14 = smov [#allocation16]  }
  0xf4   : > { %1881 = vmatpush3.bf16.msra.mxu0 %v2205_v3  ;;  %v2217_v18 = vld [vmem:[#allocation5 + $0x38] sm:$0xff]   ;;  %v503_v19 = vld [vmem:[%s2928_s12] sm:$0xff]  ;;  %v505_v20 = vld [vmem:[%s2928_s12 + $0x10] sm:$0xff]  ;;  %s2488_s30 = sshll.u32 %s2581_s14, 4  ;;  %s2489_s30 = int_to_ptr.vmem [resolvable:$false] %s2488_s30 }
  0xf5   : > { %1882 = vmatprep.subr.bf16.mxu0 %v2206_v4  ;;  %718 = vmatprep.mubr.bf16.mxu0 %v569_v13  ;;  %v508_v21 = vld [vmem:[%s2928_s12 + $0x28] sm:$0xff]  ;;  %v2218_v22 = vld [vmem:[%s3229_s3] sm:$0xff]   ;;  %v510_v23 = vld [vmem:[%s2928_s12 + $0x38] sm:$0xff]  ;;  %v568_v25 = vpack.c.bf16 %v505_v20, %v503_v19  ;;  %p2486_p1 = pnand %p2485_p12, %p3271_p13  ;;  %p2491_p2 = scmp.lt.s32.totalorder %s3178_s21, %s2489_s30 }
  0xf6   : > { %v2219_v24 = vld [vmem:[%s3229_s3 + $0x8] sm:$0xff]   ;;  %2062 = vmatprep.subr.bf16.mxu1 %v2218_v22  ;;  %v571_v26 = vpack.c.bf16 %v510_v23, %v508_v21  ;;  %v2220_v27 = vld [vmem:[%s3229_s3 + $0x10] sm:$0xff]   ;;  %v507_v28 = vld [vmem:[%s2928_s12 + $0x20] sm:$0xff] }
  0xf7   : > { %2070 = vmatpush3.bf16.msra.mxu1 %v2218_v22  ;;  %v509_v29 = vld [vmem:[%s2928_s12 + $0x30] sm:$0xff]  ;;  %v512_v30 = vld [vmem:[%s2928_s12 + $0x48] sm:$0xff]  ;;  %v514_v31 = vld [vmem:[%s2928_s12 + $0x58] sm:$0xff]  ;;  %s3176_s15 = scalar_lea.hbm %s3270_s24, %s1877_s29  ;;  %p2487_p3 = pneg %p2486_p1 }
  0xf8   : > { %1883 = vmatpush3.bf16.msra.mxu0 %v2207_v5  ;;  %2063 = vmatprep.subr.bf16.mxu1 %v2219_v24  ;;  %v2221_v32 = vld [vmem:[%s3229_s3 + $0x18] sm:$0xff]   ;;  %v570_v33 = vpack.c.bf16 %v509_v29, %v507_v28  ;;  %v573_v34 = vpack.c.bf16 %v514_v31, %v512_v30  ;;  %v2222_v35 = vld [vmem:[%s3229_s3 + $0x20] sm:$0xff]   ;;  %v513_v37 = vld [vmem:[%s2928_s12 + $0x50] sm:$0xff] }
  0xf9   : > { %1884 = vmatprep.subr.bf16.mxu0 %v2208_v6  ;;  %v511_v36 = vld [vmem:[%s2928_s12 + $0x40] sm:$0xff]  ;;  %v516_v38 = vld [vmem:[%s2928_s12 + $0x68] sm:$0xff]  ;;  %v518_v39 = vld [vmem:[%s2928_s12 + $0x78] sm:$0xff] }
  0xfa   : > { %v2223_v40 = vld [vmem:[%s3229_s3 + $0x28] sm:$0xff]   ;;  %v572_v41 = vpack.c.bf16 %v513_v37, %v511_v36  ;;  %v575_v42 = vpack.c.bf16 %v518_v39, %v516_v38  ;;  %v515_v43 = vld [vmem:[%s2928_s12 + $0x60] sm:$0xff]  ;;  %v517_v44 = vld [vmem:[%s2928_s12 + $0x70] sm:$0xff] }
  0xfb   : > { %2071 = vmatpush3.bf16.msra.mxu1 %v2219_v24  ;;  %v520_v45 = vld [vmem:[%s2928_s12 + $0x88] sm:$0xff]  ;;  %v522_v46 = vld [vmem:[%s2928_s12 + $0x98] sm:$0xff]  ;;  %v574_v47 = vpack.c.bf16 %v517_v44, %v515_v43  ;;  %v519_v49 = vld [vmem:[%s2928_s12 + $0x80] sm:$0xff] }
  0xfc   : > { %1885 = vmatpush3.bf16.msra.mxu0 %v2209_v7  ;;  %2064 = vmatprep.subr.bf16.mxu1 %v2220_v27  ;;  %v577_v48 = vpack.c.bf16 %v522_v46, %v520_v45  ;;  %v521_v50 = vld [vmem:[%s2928_s12 + $0x90] sm:$0xff]  ;;  %v524_v51 = vld [vmem:[%s2928_s12 + $0xa8] sm:$0xff]  ;;  %v526_v52 = vld [vmem:[%s2928_s12 + $0xb8] sm:$0xff] }
  0xfd   : > { %1886 = vmatprep.subr.bf16.mxu0 %v2210_v8  ;;  %v576_v53 = vpack.c.bf16 %v521_v50, %v519_v49  ;;  %v579_v54 = vpack.c.bf16 %v526_v52, %v524_v51  ;;  %v523_v55 = vld [vmem:[%s2928_s12 + $0xa0] sm:$0xff]  ;;  %v525_v56 = vld [vmem:[%s2928_s12 + $0xb0] sm:$0xff]  ;;  %v528_v57 = vld [vmem:[%s2928_s12 + $0xc8] sm:$0xff] }
  0xfe   : > { %v530_v58 = vld [vmem:[%s2928_s12 + $0xd8] sm:$0xff]  ;;  %v578_v59 = vpack.c.bf16 %v525_v56, %v523_v55  ;;  %v527_v61 = vld [vmem:[%s2928_s12 + $0xc0] sm:$0xff]  ;;  %v529_v62 = vld [vmem:[%s2928_s12 + $0xd0] sm:$0xff] }
  0xff   : > { %2072 = vmatpush3.bf16.msra.mxu1 %v2220_v27  ;;  %v581_v60 = vpack.c.bf16 %v530_v58, %v528_v57  ;;  %v532_v63 = vld [vmem:[%s2928_s12 + $0xe8] sm:$0xff]  ;;  %v534_v0 = vld [vmem:[%s2928_s12 + $0xf8] sm:$0xff]  ;;  %v580_v1 = vpack.c.bf16 %v529_v62, %v527_v61  ;;  %v531_v3 = vld [vmem:[%s2928_s12 + $0xe0] sm:$0xff] }
 0x100   : > { %1887 = vmatpush3.bf16.msra.mxu0 %v2211_v9  ;;  %2065 = vmatprep.subr.bf16.mxu1 %v2221_v32  ;;  %v583_v2 = vpack.c.bf16 %v534_v0, %v532_v63  ;;  %v533_v4 = vld [vmem:[%s2928_s12 + $0xf0] sm:$0xff]  ;;  %v2225_v7 = vld [vmem:[%s3229_s3 + $0x38] sm:$0xff]   ;;  %v3006_v8 = vld [vmem:[#allocation10] sm:$0xff]   ;;  %s2490_s12 = scalar_lea.vmem %s2489_s30, 8192 }
 0x101   : > { %1888 = vmatprep.subr.bf16.mxu0 %v2212_v10  ;;  %v582_v5 = vpack.c.bf16 %v533_v4, %v531_v3  ;;  %v2224_v6 = vld [vmem:[%s3229_s3 + $0x30] sm:$0xff]   ;;  %v3009_v10 = vld [vmem:[#allocation7] ss:$0 sm:$0xff]  ;;  %p2492_p8 = scmp.lt.s32.totalorder %s2490_s12, %s2484_s10 }
 0x103   : > { %2073 = vmatpush3.bf16.msra.mxu1 %v2221_v32  ;;  %p2493_p6 = por %p2492_p8, %p2491_p2 }
 0x104   : > { %1889 = vmatpush3.bf16.msra.mxu0 %v2213_v14  ;;  %2066 = vmatprep.subr.bf16.mxu1 %v2222_v35 }
 0x105   : > { %1890 = vmatprep.subr.bf16.mxu0 %v2214_v15  ;;  %p2494_p10 = pnand %p2493_p6, %p2487_p3 }
 0x107   : > { %2074 = vmatpush3.bf16.msra.mxu1 %v2222_v35 }
 0x108   : > { %1891 = vmatpush3.bf16.msra.mxu0 %v2215_v16  ;;  %2067 = vmatprep.subr.bf16.mxu1 %v2223_v40 }
 0x109   : > { %1892 = vmatprep.subr.bf16.mxu0 %v2216_v17 }
 0x10b   : > { %2075 = vmatpush3.bf16.msra.mxu1 %v2223_v40 }
 0x10c   : > { %1893 = vmatpush3.bf16.msra.mxu0 %v2217_v18  ;;  %2068 = vmatprep.subr.bf16.mxu1 %v2224_v6 }
 0x10d   : > { %1982 = vmatprep.subr.bf16.mxu0 %v2218_v22 }
 0x10f   : > { %719 = vmatmul.mubr.bf16.vlgmr.msra.gmra.mrb[0].mxu0 %v568_v25  ;;  %2076 = vmatpush3.bf16.msra.mxu1 %v2224_v6 }
 0x110   : > { %726 = vmatprep.mubr.bf16.mxu0 %v571_v26  ;;  %1983 = vmatpush3.bf16.msra.mxu0 %v2218_v22 }
 0x111   : > { %1984 = vmatprep.subr.bf16.mxu0 %v2219_v24  ;;  %2069 = vmatprep.subr.bf16.mxu1 %v2225_v7 }
 0x113   : > { %2077 = vmatpush3.bf16.msra.mxu1 %v2225_v7 }
 0x114   : > { %1985 = vmatpush3.bf16.msra.mxu0 %v2219_v24  ;;  %2014 = vmatprep.subr.bf16.mxu1 %v3006_v8 }
 0x115   : > { %1986 = vmatprep.subr.bf16.mxu0 %v2220_v27 }
 0x117   : > { %727 = vmatmul.mubr.bf16.gmra.mrb[4].mxu0 %v570_v33 }
 0x118   : > { %734 = vmatprep.mubr.bf16.mxu0 %v573_v34  ;;  %1987 = vmatpush3.bf16.msra.mxu0 %v2220_v27 }
 0x119   : > { %1988 = vmatprep.subr.bf16.mxu0 %v2221_v32 }
 0x11c   : > { %1989 = vmatpush3.bf16.msra.mxu0 %v2221_v32 }
 0x11d   : > { %1990 = vmatprep.subr.bf16.mxu0 %v2222_v35 }
 0x11f   : > { %735 = vmatmul.mubr.bf16.gmra.mrb[8].mxu0 %v572_v41 }
 0x120   : > { %742 = vmatprep.mubr.bf16.mxu0 %v575_v42  ;;  %1991 = vmatpush3.bf16.msra.mxu0 %v2222_v35 }
 0x121   : > { %1992 = vmatprep.subr.bf16.mxu0 %v2223_v40 }
 0x124   : > { %1993 = vmatpush3.bf16.msra.mxu0 %v2223_v40 }
 0x125   : > { %1994 = vmatprep.subr.bf16.mxu0 %v2224_v6 }
 0x127   : > { %743 = vmatmul.mubr.bf16.gmra.mrb[12].mxu0 %v574_v47 }
 0x128   : > { %750 = vmatprep.mubr.bf16.mxu0 %v577_v48  ;;  %1995 = vmatpush3.bf16.msra.mxu0 %v2224_v6 }
 0x129   : > { %1996 = vmatprep.subr.bf16.mxu0 %v2225_v7 }
 0x12c   : > { %1997 = vmatpush3.bf16.msra.mxu0 %v2225_v7 }
 0x12f   : > { %751 = vmatmul.mubr.bf16.gmra.mrb[16].mxu0 %v576_v53 }
 0x130   : > { %758 = vmatprep.mubr.bf16.mxu0 %v579_v54 }
 0x137   : > { %759 = vmatmul.mubr.bf16.gmra.mrb[20].mxu0 %v578_v59 }
 0x138   : > { %766 = vmatprep.mubr.bf16.mxu0 %v581_v60 }
 0x13f   : > { %767 = vmatmul.mubr.bf16.gmra.mrb[24].mxu0 %v580_v1 }
 0x140   : > { %774 = vmatprep.mubr.bf16.mxu0 %v583_v2 }
 0x147   : > { %775 = vmatmul.mubr.bf16.gmra.mrb[28].mxu0 %v582_v5 }
 0x1e2   : > { %v1894_v9 = vpop.f32.mrb[0].mxu0 }
 0x1e3   : > { %v1895_v11 = vpop.f32.mrb[1].mxu0 }
 0x1e4   : > { %v1896_v12 = vadd.f32 %v1895_v11, %v1894_v9  ;;  %v1897_v13 = vpop.f32.mrb[2].mxu0 }
 0x1e5   : > { %v1898_v14 = vpop.f32.mrb[3].mxu0 }
 0x1e6   : > { %v721_v15 = vadd.f32 %v1896_v12, %v3009_v10  ;;  %v1899_v16 = vadd.f32 %v1898_v14, %v1897_v13 }
 0x1e8   : > { %v724_v17 = vadd.f32 %v1899_v16, %v3009_v10  ;;  %v783_v18 = vmax.f32 %v721_v15, 0.0 }
 0x1ea   : > { %v784_v19 = vmax.f32 %v724_v17, 0.0  ;;  %v1900_v20 = vpop.f32.mrb[4].mxu0 }
 0x1eb   : > { %v1901_v21 = vpop.f32.mrb[5].mxu0 }
 0x1ec   : > { %v1902_v22 = vadd.f32 %v1901_v21, %v1900_v20  ;;  %v1903_v23 = vpop.f32.mrb[6].mxu0  ;;  %v816_v24 = vpack.c.bf16 %v784_v19, %v783_v18  ;;  %v2227_v18 = vld [vmem:[#allocation10 + $0x8] sm:$0xff]  }
 0x1ed   : > { %v1904_v25 = vpop.f32.mrb[7].mxu0 }
 0x1ee   : > { %v729_v26 = vadd.f32 %v1902_v22, %v3009_v10  ;;  %v1905_v27 = vadd.f32 %v1904_v25, %v1903_v23  ;;  %1998 = vmatprep.mubr.bf16.mxu0 %v816_v24 }
 0x1f0   : > { %v732_v28 = vadd.f32 %v1905_v27, %v3009_v10  ;;  %v785_v29 = vmax.f32 %v729_v26, 0.0 }
 0x1f2   : > { %v786_v30 = vmax.f32 %v732_v28, 0.0  ;;  %v1906_v31 = vpop.f32.mrb[8].mxu0 }
 0x1f3   : > { %v1907_v32 = vpop.f32.mrb[9].mxu0 }
 0x1f4   : > { %v817_v33 = vpack.c.bf16 %v786_v30, %v785_v29  ;;  %v1908_v34 = vadd.f32 %v1907_v32, %v1906_v31  ;;  %v1909_v35 = vpop.f32.mrb[10].mxu0 }
 0x1f5   : > { %v1910_v36 = vpop.f32.mrb[11].mxu0 }
 0x1f6   : > { %v737_v37 = vadd.f32 %v1908_v34, %v3009_v10  ;;  %v1911_v38 = vadd.f32 %v1910_v36, %v1909_v35  ;;  %1999 = vmatmul.mubr.bf16.vlgmr.msra.gmra.mrb[32].mxu0 %v817_v33  ;;  %v2228_v36 = vld [vmem:[#allocation10 + $0x10] sm:$0xff]  }
 0x1f8   : > { %v740_v39 = vadd.f32 %v1911_v38, %v3009_v10  ;;  %v787_v40 = vmax.f32 %v737_v37, 0.0  ;;  %v2229_v37 = vld [vmem:[#allocation10 + $0x18] sm:$0xff]   ;;  %v2230_v38 = vld [vmem:[#allocation13] sm:$0xff]  }
 0x1f9   : > { %2038 = vmatprep.subr.bf16.mxu0 %v2230_v38 }
 0x1fa   : > { %v788_v41 = vmax.f32 %v740_v39, 0.0  ;;  %v1912_v42 = vpop.f32.mrb[12].mxu0  ;;  %v2231_v39 = vld [vmem:[#allocation13 + $0x8] sm:$0xff]   ;;  %2039 = vmatpush3.bf16.msra.mxu0 %v2230_v38 }
 0x1fb   : > { %v1913_v43 = vpop.f32.mrb[13].mxu0  ;;  %2040 = vmatprep.subr.bf16.mxu0 %v2231_v39  ;;  %v2237_v38 = vld [vmem:[%s3268_s1 + $0x10] ss:$8 sps:$4 sm:$0xff]  }
 0x1fc   : > { %v1914_v44 = vadd.f32 %v1913_v43, %v1912_v42  ;;  %v1915_v45 = vpop.f32.mrb[14].mxu0  ;;  %v818_v46 = vpack.c.bf16 %v788_v41, %v787_v40  ;;  %v1817_v40 = vld [vmem:[#allocation8] ss:$0 sm:$0xff] }
 0x1fd   : > { %v1916_v47 = vpop.f32.mrb[15].mxu0 }
 0x1fe   : > { %v745_v48 = vadd.f32 %v1914_v44, %v3009_v10  ;;  %v1917_v49 = vadd.f32 %v1916_v47, %v1915_v45  ;;  %2002 = vmatprep.mubr.bf16.mxu0 %v818_v46  ;;  %2041 = vmatpush3.bf16.msra.mxu0 %v2231_v39  ;;  %v2242_v39 = vld [vmem:[%s3268_s1 + $0x24] ss:$8 sps:$4 sm:$0xff]  }
 0x200   : > { %v748_v50 = vadd.f32 %v1917_v49, %v3009_v10  ;;  %v789_v51 = vmax.f32 %v745_v48, 0.0 }
 0x202   : > { %v790_v52 = vmax.f32 %v748_v50, 0.0  ;;  %v1918_v53 = vpop.f32.mrb[16].mxu0 }
 0x203   : > { %v1919_v54 = vpop.f32.mrb[17].mxu0 }
 0x204   : > { %v1920_v55 = vadd.f32 %v1919_v54, %v1918_v53  ;;  %v1921_v56 = vpop.f32.mrb[18].mxu0  ;;  %v819_v57 = vpack.c.bf16 %v790_v52, %v789_v51 }
 0x205   : > { %v1922_v58 = vpop.f32.mrb[19].mxu0 }
 0x206   : > { %v1923_v59 = vadd.f32 %v1922_v58, %v1921_v56  ;;  %2003 = vmatmul.mubr.bf16.gmra.mrb[36].mxu0 %v819_v57  ;;  %v753_v60 = vadd.f32 %v1920_v55, %v3009_v10 }
 0x208   : > { %v756_v61 = vadd.f32 %v1923_v59, %v3009_v10  ;;  %v791_v63 = vmax.f32 %v753_v60, 0.0 }
 0x20a   : > { %v1924_v62 = vpop.f32.mrb[20].mxu0  ;;  %v792_v0 = vmax.f32 %v756_v61, 0.0 }
 0x20b   : > { %v1925_v1 = vpop.f32.mrb[21].mxu0 }
 0x20c   : > { %v1926_v2 = vadd.f32 %v1925_v1, %v1924_v62  ;;  %v1927_v3 = vpop.f32.mrb[22].mxu0  ;;  %v820_v4 = vpack.c.bf16 %v792_v0, %v791_v63 }
 0x20d   : > { %v1928_v5 = vpop.f32.mrb[23].mxu0 }
 0x20e   : > { %v761_v6 = vadd.f32 %v1926_v2, %v3009_v10  ;;  %v1929_v7 = vadd.f32 %v1928_v5, %v1927_v3  ;;  %2006 = vmatprep.mubr.bf16.mxu1 %v820_v4 }
 0x210   : > { %v764_v9 = vadd.f32 %v1929_v7, %v3009_v10  ;;  %v793_v11 = vmax.f32 %v761_v6, 0.0 }
 0x212   : > { %v794_v12 = vmax.f32 %v764_v9, 0.0  ;;  %v1930_v13 = vpop.f32.mrb[24].mxu0 }
 0x213   : > { %v1931_v14 = vpop.f32.mrb[25].mxu0 }
 0x214   : > { %v1932_v15 = vadd.f32 %v1931_v14, %v1930_v13  ;;  %v1933_v16 = vpop.f32.mrb[26].mxu0  ;;  %v821_v17 = vpack.c.bf16 %v794_v12, %v793_v11 }
 0x215   : > { %v1934_v19 = vpop.f32.mrb[27].mxu0 }
 0x216   : > { %v769_v20 = vadd.f32 %v1932_v15, %v3009_v10  ;;  %v1935_v21 = vadd.f32 %v1934_v19, %v1933_v16  ;;  %2007 = vmatmul.mubr.bf16.vlgmr.msra.gmra.mrb[0].mxu1 %v821_v17 }
 0x217   : > { %2015 = vmatpush3.bf16.msra.mxu1 %v3006_v8 }
 0x218   : > { %v772_v22 = vadd.f32 %v1935_v21, %v3009_v10  ;;  %2016 = vmatprep.subr.bf16.mxu1 %v2227_v18  ;;  %v795_v23 = vmax.f32 %v769_v20, 0.0 }
 0x21a   : > { %v796_v24 = vmax.f32 %v772_v22, 0.0  ;;  %v1936_v25 = vpop.f32.mrb[28].mxu0 }
 0x21b   : > { %v1937_v26 = vpop.f32.mrb[29].mxu0  ;;  %2017 = vmatpush3.bf16.msra.mxu1 %v2227_v18 }
 0x21c   : > { %v1938_v27 = vadd.f32 %v1937_v26, %v1936_v25  ;;  %v1939_v28 = vpop.f32.mrb[30].mxu0  ;;  %v822_v29 = vpack.c.bf16 %v796_v24, %v795_v23  ;;  %2018 = vmatprep.subr.bf16.mxu1 %v2228_v36 }
 0x21d   : > { %v1940_v30 = vpop.f32.mrb[31].mxu0 }
 0x21e   : > { %v777_v31 = vadd.f32 %v1938_v27, %v3009_v10  ;;  %v1941_v32 = vadd.f32 %v1940_v30, %v1939_v28  ;;  %2010 = vmatprep.mubr.bf16.mxu1 %v822_v29 }
 0x21f   : > { %2019 = vmatpush3.bf16.msra.mxu1 %v2228_v36  ;;  %v2236_v36 = vld [vmem:[%s3268_s1 + $0x4] ss:$8 sps:$4 sm:$0xff]  }
 0x220   : > { %v780_v33 = vadd.f32 %v1941_v32, %v3009_v10  ;;  %v797_v34 = vmax.f32 %v777_v31, 0.0  ;;  %2020 = vmatprep.subr.bf16.mxu1 %v2229_v37 }
 0x222   : > { %v798_v8 = vmax.f32 %v780_v33, 0.0 }
 0x223   : > { %2021 = vmatpush3.bf16.msra.mxu1 %v2229_v37  ;;  %v2239_v37 = vld [vmem:[%s3268_s1 + $0x14] ss:$8 sps:$4 sm:$0xff]  }
 0x224   : > { %v823_v35 = vpack.c.bf16 %v798_v8, %v797_v34  ;;  %v2232_v34 = vld [vmem:[#allocation13 + $0x10] sm:$0xff]   ;;  %v2233_v8 = vld [vmem:[#allocation13 + $0x18] sm:$0xff]   ;;  %1476 = vmatprep.subr.bf16.mxu1 %v2236_v36 }
 0x225   : > { %2042 = vmatprep.subr.bf16.mxu0 %v2232_v34 }
 0x226   : > { %2011 = vmatmul.mubr.bf16.gmra.mrb[4].mxu1 %v823_v35  ;;  %2043 = vmatpush3.bf16.msra.mxu0 %v2232_v34  ;;  %v2234_v35 = vld [vmem:[%s3268_s1] ss:$8 sps:$4 sm:$0xff]  }
 0x227   : > { %2044 = vmatprep.subr.bf16.mxu0 %v2233_v8 }
 0x22a   : > { %2045 = vmatpush3.bf16.msra.mxu0 %v2233_v8 }
 0x2c9   : > { %v2000_v41 = vpop.f32.mrb[32].mxu0 }
 0x2ca   : > { %v921_v42 = vadd.f32 %v2000_v41, %v1817_v40  ;;  %v912_v10 = vpop.f32.mrb[33].mxu0  ;;  %v2245_v41 = vld [vmem:[%s3268_s1 + $0x34] ss:$8 sps:$4 sm:$0xff]  }
 0x2cb   : > { %v913_v43 = vadd.f32 %v1817_v40, %v912_v10  ;;  %v2001_v44 = vpop.f32.mrb[34].mxu0  ;;  %v2248_v10 = vld [vmem:[%s3268_s1 + $0x44] ss:$8 sps:$4 sm:$0xff]  }
 0x2cc   : > { %v924_v45 = vadd.f32 %v2001_v44, %v1817_v40  ;;  %v915_v46 = vpop.f32.mrb[35].mxu0  ;;  %v977_v48 = vmax.f32 %v921_v42, 0.0  ;;  %v2243_v42 = vld [vmem:[%s3268_s1 + $0x30] ss:$8 sps:$4 sm:$0xff]   ;;  %v2251_v44 = vld [vmem:[%s3268_s1 + $0x54] ss:$8 sps:$4 sm:$0xff]  }
 0x2cd   : > { %v916_v47 = vadd.f32 %v1817_v40, %v915_v46  ;;  %v975_v50 = vmax.f32 %v913_v43, 0.0  ;;  %v2246_v43 = vld [vmem:[%s3268_s1 + $0x40] ss:$8 sps:$4 sm:$0xff]   ;;  %v1826_v46 = vld [vmem:[#allocation11] ss:$0 sm:$0xff] }
 0x2ce   : > { %v978_v49 = vmax.f32 %v924_v45, 0.0  ;;  %v2249_v45 = vld [vmem:[%s3268_s1 + $0x50] ss:$8 sps:$4 sm:$0xff]  }
 0x2cf   : > { %v976_v51 = vmax.f32 %v916_v47, 0.0 }
 0x2d0   : > { %v1001_v52 = vpack.c.bf16 %v978_v49, %v977_v48 }
 0x2d1   : > { %v1000_v53 = vpack.c.bf16 %v976_v51, %v975_v50 }
 0x2d3   : > { %2022 = vmatprep.mubr.msk.bf16.mxu1 %vm1038_vm0, %v1000_v53 }
 0x2d4   : > { %2023 = vmatmul.mubr.msk.bf16.vlgmr.msra.gmra.mrb[8].mxu1 %vm1038_vm0, %v1001_v52 }
 0x2d5   : > { %1477 = vmatpush1.bf16.msra.mxu1 %v2234_v35 }
 0x2d6   : > { %1478 = vmatprep.subr.bf16.mxu1 %v2239_v37 }
 0x2d9   : > { %v2004_v54 = vpop.f32.mrb[36].mxu0  ;;  %1479 = vmatpush1.bf16.msra.mxu1 %v2237_v38 }
 0x2da   : > { %v937_v55 = vadd.f32 %v2004_v54, %v1817_v40  ;;  %v928_v56 = vpop.f32.mrb[37].mxu0  ;;  %1480 = vmatprep.subr.bf16.mxu1 %v2242_v39 }
 0x2db   : > { %v929_v57 = vadd.f32 %v1817_v40, %v928_v56  ;;  %v2005_v58 = vpop.f32.mrb[38].mxu0 }
 0x2dc   : > { %v940_v59 = vadd.f32 %v2005_v58, %v1817_v40  ;;  %v931_v60 = vpop.f32.mrb[39].mxu0  ;;  %v981_v62 = vmax.f32 %v937_v55, 0.0 }
 0x2dd   : > { %v932_v61 = vadd.f32 %v1817_v40, %v931_v60  ;;  %v979_v0 = vmax.f32 %v929_v57, 0.0 }
 0x2de   : > { %v982_v63 = vmax.f32 %v940_v59, 0.0 }
 0x2df   : > { %v980_v1 = vmax.f32 %v932_v61, 0.0 }
 0x2e0   : > { %v1003_v2 = vpack.c.bf16 %v982_v63, %v981_v62 }
 0x2e1   : > { %v1002_v3 = vpack.c.bf16 %v980_v1, %v979_v0 }
 0x2e3   : > { %2026 = vmatprep.mubr.msk.bf16.mxu1 %vm1038_vm0, %v1002_v3 }
 0x2e4   : > { %2027 = vmatmul.mubr.msk.bf16.gmra.mrb[12].mxu1 %vm1038_vm0, %v1003_v2 }
 0x2e9   : > { %v2008_v4 = vpop.f32.mrb[0].mxu1 }
 0x2ea   : > { %v953_v5 = vadd.f32 %v2008_v4, %v1817_v40  ;;  %v944_v6 = vpop.f32.mrb[1].mxu1 }
 0x2eb   : > { %v945_v7 = vadd.f32 %v1817_v40, %v944_v6  ;;  %v2009_v9 = vpop.f32.mrb[2].mxu1 }
 0x2ec   : > { %v956_v11 = vadd.f32 %v2009_v9, %v1817_v40  ;;  %v947_v12 = vpop.f32.mrb[3].mxu1  ;;  %v985_v14 = vmax.f32 %v953_v5, 0.0 }
 0x2ed   : > { %v948_v13 = vadd.f32 %v1817_v40, %v947_v12  ;;  %v983_v16 = vmax.f32 %v945_v7, 0.0 }
 0x2ee   : > { %v986_v15 = vmax.f32 %v956_v11, 0.0 }
 0x2ef   : > { %v984_v17 = vmax.f32 %v948_v13, 0.0 }
 0x2f0   : > { %v1005_v18 = vpack.c.bf16 %v986_v15, %v985_v14 }
 0x2f1   : > { %v1004_v19 = vpack.c.bf16 %v984_v17, %v983_v16 }
 0x2f3   : > { %2030 = vmatprep.mubr.msk.bf16.mxu1 %vm1038_vm0, %v1004_v19 }
 0x2f4   : > { %2031 = vmatmul.mubr.msk.bf16.gmra.mrb[16].mxu1 %vm1038_vm0, %v1005_v18 }
 0x2f9   : > { %v2012_v20 = vpop.f32.mrb[4].mxu1 }
 0x2fa   : > { %v969_v21 = vadd.f32 %v2012_v20, %v1817_v40  ;;  %v960_v22 = vpop.f32.mrb[5].mxu1 }
 0x2fb   : > { %v961_v23 = vadd.f32 %v1817_v40, %v960_v22  ;;  %v2013_v24 = vpop.f32.mrb[6].mxu1 }
 0x2fc   : > { %v972_v25 = vadd.f32 %v2013_v24, %v1817_v40  ;;  %v963_v26 = vpop.f32.mrb[7].mxu1  ;;  %v989_v28 = vmax.f32 %v969_v21, 0.0 }
 0x2fd   : > { %v964_v27 = vadd.f32 %v1817_v40, %v963_v26  ;;  %v987_v30 = vmax.f32 %v961_v23, 0.0  ;;  %v2240_v40 = vld [vmem:[%s3268_s1 + $0x20] ss:$8 sps:$4 sm:$0xff]  }
 0x2fe   : > { %v990_v29 = vmax.f32 %v972_v25, 0.0  ;;  %1481 = vmatpush1.bf16.msra.mxu1 %v2240_v40  ;;  %v2254_v40 = vld [vmem:[%s3268_s1 + $0x64] ss:$8 sps:$4 sm:$0xff]  }
 0x2ff   : > { %v988_v31 = vmax.f32 %v964_v27, 0.0  ;;  %1482 = vmatprep.subr.bf16.mxu1 %v2245_v41  ;;  %v2252_v41 = vld [vmem:[%s3268_s1 + $0x60] ss:$8 sps:$4 sm:$0xff]  }
 0x300   : > { %v1007_v32 = vpack.c.bf16 %v990_v29, %v989_v28 }
 0x301   : > { %v1006_v33 = vpack.c.bf16 %v988_v31, %v987_v30 }
 0x302   : > { %1483 = vmatpush1.bf16.msra.mxu1 %v2243_v42  ;;  %v2257_v42 = vld [vmem:[%s3268_s1 + $0x74] ss:$8 sps:$4 sm:$0xff]  }
 0x303   : > { %2034 = vmatprep.mubr.msk.bf16.mxu1 %vm1038_vm0, %v1006_v33  ;;  %1484 = vmatprep.subr.bf16.mxu1 %v2248_v10  ;;  %v2255_v10 = vld [vmem:[%s3268_s1 + $0x70] ss:$8 sps:$4 sm:$0xff]  }
 0x304   : > { %2035 = vmatmul.mubr.msk.bf16.gmra.mrb[20].mxu1 %vm1038_vm0, %v1007_v32 }
 0x306   : > { %1485 = vmatpush1.bf16.msra.mxu1 %v2246_v43  ;;  %v2580_v43 = vmov 0  }
 0x307   : > { %1486 = vmatprep.subr.bf16.mxu1 %v2251_v44  ;;  %1508 = vmatprep.mubr.bf16.mxu1 %v2580_v43  ;;  %v1839_v44 = vld [vmem:[#allocation14] ss:$0 sm:$0xff] }
 0x30a   : > { %1487 = vmatpush1.bf16.msra.mxu1 %v2249_v45 }
 0x30b   : > { %1488 = vmatprep.subr.bf16.mxu1 %v2254_v40 }
 0x30e   : > { %1489 = vmatpush1.bf16.msra.mxu1 %v2252_v41  ;;  %v1376_v41 = vld [vmem:[%s3269_s16] sm:$0x3] }
 0x30f   : > { %1490 = vmatprep.subr.bf16.mxu1 %v2257_v42 }
 0x312   : > { %1491 = vmatpush1.bf16.msra.mxu1 %v2255_v10 }
 0x3a7   : > { %v2024_v47 = vpop.f32.mrb[8].mxu1 }
 0x3a8   : > { %v1106_v48 = vadd.f32 %v2024_v47, %v1826_v46  ;;  %v1097_v49 = vpop.f32.mrb[9].mxu1 }
 0x3a9   : > { %v1098_v50 = vadd.f32 %v1826_v46, %v1097_v49  ;;  %v2025_v51 = vpop.f32.mrb[10].mxu1 }
 0x3aa   : > { %v1109_v52 = vadd.f32 %v2025_v51, %v1826_v46  ;;  %v1100_v53 = vpop.f32.mrb[11].mxu1  ;;  %v1162_v55 = vmax.f32 %v1106_v48, 0.0 }
 0x3ab   : > { %v1101_v54 = vadd.f32 %v1826_v46, %v1100_v53  ;;  %v1160_v57 = vmax.f32 %v1098_v50, 0.0 }
 0x3ac   : > { %v1163_v56 = vmax.f32 %v1109_v52, 0.0 }
 0x3ad   : > { %v1161_v58 = vmax.f32 %v1101_v54, 0.0 }
 0x3ae   : > { %v1186_v59 = vpack.c.bf16 %v1163_v56, %v1162_v55 }
 0x3af   : > { %v1185_v60 = vpack.c.bf16 %v1161_v58, %v1160_v57 }
 0x3b1   : > { %2046 = vmatprep.mubr.msk.bf16.mxu0 %vm1038_vm0, %v1185_v60 }
 0x3b2   : > { %2047 = vmatmul.mubr.msk.bf16.vlgmr.msra.gmra.mrb[40].mxu0 %vm1038_vm0, %v1186_v59 }
 0x3b7   : > { %v2028_v61 = vpop.f32.mrb[12].mxu1 }
 0x3b8   : > { %v1122_v62 = vadd.f32 %v2028_v61, %v1826_v46  ;;  %v1113_v63 = vpop.f32.mrb[13].mxu1 }
 0x3b9   : > { %v1114_v0 = vadd.f32 %v1826_v46, %v1113_v63  ;;  %v2029_v1 = vpop.f32.mrb[14].mxu1 }
 0x3ba   : > { %v1125_v2 = vadd.f32 %v2029_v1, %v1826_v46  ;;  %v1116_v3 = vpop.f32.mrb[15].mxu1  ;;  %v1166_v5 = vmax.f32 %v1122_v62, 0.0 }
 0x3bb   : > { %v1117_v4 = vadd.f32 %v1826_v46, %v1116_v3  ;;  %v1164_v7 = vmax.f32 %v1114_v0, 0.0 }
 0x3bc   : > { %v1167_v6 = vmax.f32 %v1125_v2, 0.0 }
 0x3bd   : > { %v1165_v9 = vmax.f32 %v1117_v4, 0.0 }
 0x3be   : > { %v1188_v11 = vpack.c.bf16 %v1167_v6, %v1166_v5 }
 0x3bf   : > { %v1187_v12 = vpack.c.bf16 %v1165_v9, %v1164_v7 }
 0x3c1   : > { %2050 = vmatprep.mubr.msk.bf16.mxu0 %vm1038_vm0, %v1187_v12 }
 0x3c2   : > { %2051 = vmatmul.mubr.msk.bf16.gmra.mrb[44].mxu0 %vm1038_vm0, %v1188_v11 }
 0x3c7   : > { %v2032_v13 = vpop.f32.mrb[16].mxu1 }
 0x3c8   : > { %v1138_v14 = vadd.f32 %v2032_v13, %v1826_v46  ;;  %v1129_v15 = vpop.f32.mrb[17].mxu1 }
 0x3c9   : > { %v1130_v16 = vadd.f32 %v1826_v46, %v1129_v15  ;;  %v2033_v17 = vpop.f32.mrb[18].mxu1 }
 0x3ca   : > { %v1141_v18 = vadd.f32 %v2033_v17, %v1826_v46  ;;  %v1132_v19 = vpop.f32.mrb[19].mxu1  ;;  %v1170_v21 = vmax.f32 %v1138_v14, 0.0 }
 0x3cb   : > { %v1133_v20 = vadd.f32 %v1826_v46, %v1132_v19  ;;  %v1168_v23 = vmax.f32 %v1130_v16, 0.0 }
 0x3cc   : > { %v1171_v22 = vmax.f32 %v1141_v18, 0.0 }
 0x3cd   : > { %v1169_v24 = vmax.f32 %v1133_v20, 0.0 }
 0x3ce   : > { %v1190_v25 = vpack.c.bf16 %v1171_v22, %v1170_v21 }
 0x3cf   : > { %v1189_v26 = vpack.c.bf16 %v1169_v24, %v1168_v23 }
 0x3d1   : > { %2054 = vmatprep.mubr.msk.bf16.mxu0 %vm1038_vm0, %v1189_v26 }
 0x3d2   : > { %2055 = vmatmul.mubr.msk.bf16.gmra.mrb[48].mxu0 %vm1038_vm0, %v1190_v25 }
 0x3d7   : > { %v2036_v27 = vpop.f32.mrb[20].mxu1 }
 0x3d8   : > { %v1154_v28 = vadd.f32 %v2036_v27, %v1826_v46  ;;  %v1145_v29 = vpop.f32.mrb[21].mxu1 }
 0x3d9   : > { %v1146_v30 = vadd.f32 %v1826_v46, %v1145_v29  ;;  %v2037_v31 = vpop.f32.mrb[22].mxu1 }
 0x3da   : > { %v1157_v32 = vadd.f32 %v2037_v31, %v1826_v46  ;;  %v1148_v33 = vpop.f32.mrb[23].mxu1  ;;  %v1174_v8 = vmax.f32 %v1154_v28, 0.0 }
 0x3db   : > { %v1149_v34 = vadd.f32 %v1826_v46, %v1148_v33  ;;  %v1172_v36 = vmax.f32 %v1146_v30, 0.0 }
 0x3dc   : > { %v1175_v35 = vmax.f32 %v1157_v32, 0.0 }
 0x3dd   : > { %v1173_v37 = vmax.f32 %v1149_v34, 0.0 }
 0x3de   : > { %v1192_v38 = vpack.c.bf16 %v1175_v35, %v1174_v8 }
 0x3df   : > { %v1191_v39 = vpack.c.bf16 %v1173_v37, %v1172_v36 }
 0x3e1   : > { %2058 = vmatprep.mubr.msk.bf16.mxu0 %vm1038_vm0, %v1191_v39 }
 0x3e2   : > { %2059 = vmatmul.mubr.msk.bf16.gmra.mrb[52].mxu0 %vm1038_vm0, %v1192_v38  ;;  %v1386_v38 = vlaneseq }
 0x3e4   : > { %v1387_v39 = vshrl.u32 %v1386_v38, 7 }
 0x3e6   : > { %v1388_v40 = vsub.s32 0, %v1387_v39  ;;  %v1392_v42 = vsub.s32 1, %v1387_v39 }
 0x3e8   : > { %v3103_v10 = vrot.slane %v1376_v41, %v1388_v40 }
 0x485   : > { %v2048_v45 = vpop.f32.mrb[40].mxu0 }
 0x486   : > { %v1290_v46 = vadd.f32 %v2048_v45, %v1839_v44  ;;  %v1281_v47 = vpop.f32.mrb[41].mxu0 }
 0x487   : > { %v1282_v48 = vadd.f32 %v1839_v44, %v1281_v47  ;;  %v2049_v49 = vpop.f32.mrb[42].mxu0 }
 0x488   : > { %v1293_v50 = vadd.f32 %v2049_v49, %v1839_v44  ;;  %v1284_v51 = vpop.f32.mrb[43].mxu0  ;;  %v1346_v53 = vmax.f32 %v1290_v46, 0.0 }
 0x489   : > { %v1285_v52 = vadd.f32 %v1839_v44, %v1284_v51  ;;  %v1344_v55 = vmax.f32 %v1282_v48, 0.0 }
 0x48a   : > { %v1347_v54 = vmax.f32 %v1293_v50, 0.0 }
 0x48b   : > { %v1345_v56 = vmax.f32 %v1285_v52, 0.0 }
 0x48c   : > { %v1378_v57 = vpack.c.bf16 %v1347_v54, %v1346_v53 }
 0x48d   : > { %v1377_v58 = vpack.c.bf16 %v1345_v56, %v1344_v55 }
 0x48f   : > { %1509 = vmatmul.mubr.bf16.vlgmr.msra.gmra.mrb[24].mxu1 %v1377_v58 }
 0x490   : > { %1518 = vmatprep.mubr.bf16.mxu1 %v2580_v43 }
 0x495   : > { %v2052_v59 = vpop.f32.mrb[44].mxu0 }
 0x496   : > { %v1306_v60 = vadd.f32 %v2052_v59, %v1839_v44  ;;  %v1297_v61 = vpop.f32.mrb[45].mxu0 }
 0x497   : > { %v1298_v62 = vadd.f32 %v1839_v44, %v1297_v61  ;;  %v2053_v63 = vpop.f32.mrb[46].mxu0  ;;  %1519 = vmatmul.mubr.bf16.gmra.mrb[28].mxu1 %v1378_v57 }
 0x498   : > { %v1309_v0 = vadd.f32 %v2053_v63, %v1839_v44  ;;  %v1300_v1 = vpop.f32.mrb[47].mxu0  ;;  %1528 = vmatprep.mubr.bf16.mxu1 %v2580_v43  ;;  %v1350_v3 = vmax.f32 %v1306_v60, 0.0 }
 0x499   : > { %v1301_v2 = vadd.f32 %v1839_v44, %v1300_v1  ;;  %v1348_v5 = vmax.f32 %v1298_v62, 0.0 }
 0x49a   : > { %v1351_v4 = vmax.f32 %v1309_v0, 0.0 }
 0x49b   : > { %v1349_v6 = vmax.f32 %v1301_v2, 0.0 }
 0x49c   : > { %v1380_v7 = vpack.c.bf16 %v1351_v4, %v1350_v3 }
 0x49d   : > { %v1379_v9 = vpack.c.bf16 %v1349_v6, %v1348_v5 }
 0x49f   : > { %1529 = vmatmul.mubr.bf16.gmra.mrb[32].mxu1 %v1379_v9 }
 0x4a0   : > { %1538 = vmatprep.mubr.bf16.mxu1 %v2580_v43 }
 0x4a5   : > { %v2056_v11 = vpop.f32.mrb[48].mxu0 }
 0x4a6   : > { %v1322_v12 = vadd.f32 %v2056_v11, %v1839_v44  ;;  %v1313_v13 = vpop.f32.mrb[49].mxu0 }
 0x4a7   : > { %v1314_v14 = vadd.f32 %v1839_v44, %v1313_v13  ;;  %v2057_v15 = vpop.f32.mrb[50].mxu0  ;;  %1539 = vmatmul.mubr.bf16.gmra.mrb[36].mxu1 %v1380_v7 }
 0x4a8   : > { %v1325_v16 = vadd.f32 %v2057_v15, %v1839_v44  ;;  %v1316_v17 = vpop.f32.mrb[51].mxu0  ;;  %1548 = vmatprep.mubr.bf16.mxu1 %v2580_v43  ;;  %v1354_v19 = vmax.f32 %v1322_v12, 0.0 }
 0x4a9   : > { %v1317_v18 = vadd.f32 %v1839_v44, %v1316_v17  ;;  %v1352_v21 = vmax.f32 %v1314_v14, 0.0 }
 0x4aa   : > { %v1355_v20 = vmax.f32 %v1325_v16, 0.0 }
 0x4ab   : > { %v1353_v22 = vmax.f32 %v1317_v18, 0.0 }
 0x4ac   : > { %v1382_v23 = vpack.c.bf16 %v1355_v20, %v1354_v19 }
 0x4ad   : > { %v1381_v24 = vpack.c.bf16 %v1353_v22, %v1352_v21 }
 0x4af   : > { %1549 = vmatmul.mubr.bf16.gmra.mrb[40].mxu1 %v1381_v24 }
 0x4b0   : > { %1558 = vmatprep.mubr.bf16.mxu1 %v2580_v43 }
 0x4b5   : > { %v2060_v25 = vpop.f32.mrb[52].mxu0 }
 0x4b6   : > { %v1338_v26 = vadd.f32 %v2060_v25, %v1839_v44  ;;  %v1329_v27 = vpop.f32.mrb[53].mxu0 }
 0x4b7   : > { %v1330_v28 = vadd.f32 %v1839_v44, %v1329_v27  ;;  %v2061_v29 = vpop.f32.mrb[54].mxu0  ;;  %1559 = vmatmul.mubr.bf16.gmra.mrb[44].mxu1 %v1382_v23 }
 0x4b8   : > { %v1341_v30 = vadd.f32 %v2061_v29, %v1839_v44  ;;  %v1332_v31 = vpop.f32.mrb[55].mxu0  ;;  %1568 = vmatprep.mubr.bf16.mxu1 %v2580_v43  ;;  %v1358_v33 = vmax.f32 %v1338_v26, 0.0 }
 0x4b9   : > { %v1333_v32 = vadd.f32 %v1839_v44, %v1332_v31  ;;  %v1356_v8 = vmax.f32 %v1330_v28, 0.0  ;;  %v3105_v44 = vrot.slane %v1376_v41, %v1392_v42 }
 0x4ba   : > { %v1359_v34 = vmax.f32 %v1341_v30, 0.0 }
 0x4bb   : > { %v1357_v35 = vmax.f32 %v1333_v32, 0.0 }
 0x4bc   : > { %v1384_v36 = vpack.c.bf16 %v1359_v34, %v1358_v33 }
 0x4bd   : > { %v1383_v37 = vpack.c.bf16 %v1357_v35, %v1356_v8 }
 0x4bf   : > { %1569 = vmatmul.mubr.bf16.gmra.mrb[48].mxu1 %v1383_v37 }
 0x4c0   : > { %1578 = vmatprep.mubr.bf16.mxu1 %v2580_v43 }
 0x4c7   : > { %1579 = vmatmul.mubr.bf16.gmra.mrb[52].mxu1 %v1384_v36 }
 0x562   : > { %v1510_v45 = vpop.f32.mrb[24].mxu1 }
 0x563   : > { %v1511_v46 = vadd.f32 %v1510_v45, %v3103_v10  ;;  %v1512_v47 = vpop.f32.mrb[25].mxu1 }
 0x564   : > { %v1513_v48 = vadd.f32 %v1512_v47, %v3105_v44  ;;  %v1514_v43 = vpop.f32.mrb[26].mxu1 }
 0x565   : > { %1589 = vst [vmem:[%s3111_s26] sm:$0xff] %v1511_v46  ;;  %v1515_v49 = vadd.f32 %v1514_v43, %v3103_v10  ;;  %v1516_v50 = vpop.f32.mrb[27].mxu1 }
 0x566   : > { %1590 = vst [vmem:[%s3111_s26 + $0x8] sm:$0xff] %v1513_v48  ;;  %v1517_v51 = vadd.f32 %v1516_v50, %v3105_v44 }
 0x567   : > { %1591 = vst [vmem:[%s3111_s26 + $0x10] sm:$0xff] %v1515_v49 }
 0x568   : > { %1592 = vst [vmem:[%s3111_s26 + $0x18] sm:$0xff] %v1517_v51 }
 0x56a   : > { %v1520_v52 = vpop.f32.mrb[28].mxu1 }
 0x56b   : > { %v1521_v53 = vadd.f32 %v1520_v52, %v3103_v10  ;;  %v1522_v54 = vpop.f32.mrb[29].mxu1 }
 0x56c   : > { %v1523_v55 = vadd.f32 %v1522_v54, %v3105_v44  ;;  %v1524_v56 = vpop.f32.mrb[30].mxu1 }
 0x56d   : > { %1593 = vst [vmem:[%s3111_s26 + $0x20] sm:$0xff] %v1521_v53  ;;  %v1525_v57 = vadd.f32 %v1524_v56, %v3103_v10  ;;  %v1526_v58 = vpop.f32.mrb[31].mxu1 }
 0x56e   : > { %1594 = vst [vmem:[%s3111_s26 + $0x28] sm:$0xff] %v1523_v55  ;;  %v1527_v59 = vadd.f32 %v1526_v58, %v3105_v44 }
 0x56f   : > { %1595 = vst [vmem:[%s3111_s26 + $0x30] sm:$0xff] %v1525_v57 }
 0x570   : > { %1596 = vst [vmem:[%s3111_s26 + $0x38] sm:$0xff] %v1527_v59 }
 0x572   : > { %v1530_v60 = vpop.f32.mrb[32].mxu1 }
 0x573   : > { %v1531_v61 = vadd.f32 %v1530_v60, %v3103_v10  ;;  %v1532_v62 = vpop.f32.mrb[33].mxu1 }
 0x574   : > { %v1533_v63 = vadd.f32 %v1532_v62, %v3105_v44  ;;  %v1534_v0 = vpop.f32.mrb[34].mxu1 }
 0x575   : > { %1597 = vst [vmem:[%s3111_s26 + $0x40] sm:$0xff] %v1531_v61  ;;  %v1535_v1 = vadd.f32 %v1534_v0, %v3103_v10  ;;  %v1536_v2 = vpop.f32.mrb[35].mxu1 }
 0x576   : > { %1598 = vst [vmem:[%s3111_s26 + $0x48] sm:$0xff] %v1533_v63  ;;  %v1537_v3 = vadd.f32 %v1536_v2, %v3105_v44 }
 0x577   : > { %1599 = vst [vmem:[%s3111_s26 + $0x50] sm:$0xff] %v1535_v1 }
 0x578   : > { %1600 = vst [vmem:[%s3111_s26 + $0x58] sm:$0xff] %v1537_v3 }
 0x57a   : > { %v1540_v4 = vpop.f32.mrb[36].mxu1 }
 0x57b   : > { %v1541_v5 = vadd.f32 %v1540_v4, %v3103_v10  ;;  %v1542_v6 = vpop.f32.mrb[37].mxu1 }
 0x57c   : > { %v1543_v7 = vadd.f32 %v1542_v6, %v3105_v44  ;;  %v1544_v9 = vpop.f32.mrb[38].mxu1 }
 0x57d   : > { %1601 = vst [vmem:[%s3111_s26 + $0x60] sm:$0xff] %v1541_v5  ;;  %v1545_v11 = vadd.f32 %v1544_v9, %v3103_v10  ;;  %v1546_v12 = vpop.f32.mrb[39].mxu1 }
 0x57e   : > { %1602 = vst [vmem:[%s3111_s26 + $0x68] sm:$0xff] %v1543_v7  ;;  %v1547_v13 = vadd.f32 %v1546_v12, %v3105_v44 }
 0x57f   : > { %1603 = vst [vmem:[%s3111_s26 + $0x70] sm:$0xff] %v1545_v11 }
 0x580   : > { %1604 = vst [vmem:[%s3111_s26 + $0x78] sm:$0xff] %v1547_v13 }
 0x582   : > { %v1550_v14 = vpop.f32.mrb[40].mxu1 }
 0x583   : > { %v1551_v15 = vadd.f32 %v1550_v14, %v3103_v10  ;;  %v1552_v16 = vpop.f32.mrb[41].mxu1 }
 0x584   : > { %v1553_v17 = vadd.f32 %v1552_v16, %v3105_v44  ;;  %v1554_v18 = vpop.f32.mrb[42].mxu1 }
 0x585   : > { %1605 = vst [vmem:[%s3111_s26 + $0x80] sm:$0xff] %v1551_v15  ;;  %v1555_v19 = vadd.f32 %v1554_v18, %v3103_v10  ;;  %v1556_v20 = vpop.f32.mrb[43].mxu1 }
 0x586   : > { %1606 = vst [vmem:[%s3111_s26 + $0x88] sm:$0xff] %v1553_v17  ;;  %v1557_v21 = vadd.f32 %v1556_v20, %v3105_v44 }
 0x587   : > { %1607 = vst [vmem:[%s3111_s26 + $0x90] sm:$0xff] %v1555_v19 }
 0x588   : > { %1608 = vst [vmem:[%s3111_s26 + $0x98] sm:$0xff] %v1557_v21 }
 0x58a   : > { %v1560_v22 = vpop.f32.mrb[44].mxu1 }
 0x58b   : > { %v1561_v23 = vadd.f32 %v1560_v22, %v3103_v10  ;;  %v1562_v24 = vpop.f32.mrb[45].mxu1 }
 0x58c   : > { %v1563_v25 = vadd.f32 %v1562_v24, %v3105_v44  ;;  %v1564_v26 = vpop.f32.mrb[46].mxu1 }
 0x58d   : > { %1609 = vst [vmem:[%s3111_s26 + $0xa0] sm:$0xff] %v1561_v23  ;;  %v1565_v27 = vadd.f32 %v1564_v26, %v3103_v10  ;;  %v1566_v28 = vpop.f32.mrb[47].mxu1 }
 0x58e   : > { %1610 = vst [vmem:[%s3111_s26 + $0xa8] sm:$0xff] %v1563_v25  ;;  %v1567_v29 = vadd.f32 %v1566_v28, %v3105_v44 }
 0x58f   : > { %1611 = vst [vmem:[%s3111_s26 + $0xb0] sm:$0xff] %v1565_v27 }
 0x590   : > { %1612 = vst [vmem:[%s3111_s26 + $0xb8] sm:$0xff] %v1567_v29 }
 0x592   : > { %v1570_v30 = vpop.f32.mrb[48].mxu1 }
 0x593   : > { %v1571_v31 = vadd.f32 %v1570_v30, %v3103_v10  ;;  %v1572_v32 = vpop.f32.mrb[49].mxu1 }
 0x594   : > { %v1573_v33 = vadd.f32 %v1572_v32, %v3105_v44  ;;  %v1574_v34 = vpop.f32.mrb[50].mxu1 }
 0x595   : > { %1613 = vst [vmem:[%s3111_s26 + $0xc0] sm:$0xff] %v1571_v31  ;;  %v1575_v8 = vadd.f32 %v1574_v34, %v3103_v10  ;;  %v1576_v35 = vpop.f32.mrb[51].mxu1 }
 0x596   : > { %1614 = vst [vmem:[%s3111_s26 + $0xc8] sm:$0xff] %v1573_v33  ;;  %v1577_v36 = vadd.f32 %v1576_v35, %v3105_v44 }
 0x597   : > { %1615 = vst [vmem:[%s3111_s26 + $0xd0] sm:$0xff] %v1575_v8 }
 0x598   : > { %1616 = vst [vmem:[%s3111_s26 + $0xd8] sm:$0xff] %v1577_v36 }
 0x59a   : > { %v1580_v37 = vpop.f32.mrb[52].mxu1 }
 0x59b   : > { %v1581_v38 = vadd.f32 %v1580_v37, %v3103_v10  ;;  %v1582_v39 = vpop.f32.mrb[53].mxu1 }
 0x59c   : > { %v1583_v40 = vadd.f32 %v1582_v39, %v3105_v44  ;;  %v1584_v41 = vpop.f32.mrb[54].mxu1 }
 0x59d   : > { %1617 = vst [vmem:[%s3111_s26 + $0xe0] sm:$0xff] %v1581_v38  ;;  %v1585_v42 = vadd.f32 %v1584_v41, %v3103_v10  ;;  %v1586_v45 = vpop.f32.mrb[55].mxu1 }
 0x59e   : > { %1618 = vst [vmem:[%s3111_s26 + $0xe8] sm:$0xff] %v1583_v40  ;;  %v1587_v46 = vadd.f32 %v1586_v45, %v3105_v44 }
 0x59f   : > { %1619 = vst [vmem:[%s3111_s26 + $0xf0] sm:$0xff] %v1585_v42 }
 0x5a0   : > { %1620 = vst [vmem:[%s3111_s26 + $0xf8] sm:$0xff] %v1587_v46 }
 0x5a1   : > { %2497 = shalt.err (!%p2494_p10)
}
 0x5a2   : > { %s2498_s16 = scalar_lea.hbm %s3176_s15, 4096  ;;  %s2502_s11 = scalar_lea.hbm %s3270_s24, 8192 }
 0x5a3   : > { %p2499_p11 = scmp.ne.s32.totalorder %s3176_s15, %s2498_s16  ;;  %p2503_p9 = scmp.lt.u32.totalorder %s3176_s15, %s3270_s24 }
 0x5a4   : > { %p2504_p7 = scmp.lt.u32.totalorder %s2502_s11, %s2498_s16  ;;  %p2506_p12 = scmp.lt.u32.totalorder %s2498_s16, %s3176_s15 }
 0x5a5   : > { %p2500_p0 = pnand %p2499_p11, %p3271_p13 }
 0x5a6   : > { %p2505_p4 = por %p2504_p7, %p2503_p9 }
 0x5a7   : > { %p2501_p5 = pneg %p2500_p0 }
 0x5a8   : > { %p2507_p1 = por %p2506_p12, %p2505_p4 }
 0x5aa   : > { %p2508_p3 = pnand %p2507_p1, %p2501_p5 }
 0x5ac   : > { %2511 = shalt.err (!%p2508_p3)
}
 0x5ad   : > { %s2582_s10 = smov 256   ;;  %s2583_s30 = smov 16  }
 0x5ae   : > { %2108 = dma.vmem_to_hbm [thread:$0]  (%p3271_p13), %s3178_s21, 4096, %s3176_s15, %s1622_s23, %s2582_s10, %s2582_s10, %s2583_s30  }
 0x5af PF: > { %s1651_s12 = sand.u32 1, %s2554_s17   ;;  %p3272_p2 = scmp.ne.s32.totalorder %s3257_s22, 0 }
 0x5b0   : > { %p3273_p8 = scmp.ge.s32.totalorder %s2566_s20, 2  ;;  %s1652_s16 = scalar_lea.sflag [#allocation4], %s1651_s12 }
 0x5b2   : > { %p2137_p6 = pnand %p3273_p8, %p3272_p2 }
 0x5b4   : > { %2549 = dma.done.wait (!%p2137_p6), %s1652_s16, 4096  }
 0x5b5   : > { %2551 = vsyncadd (!%p2137_p6), %s1652_s16, 4294963200  ;;  %p28_p10 = scmp.ge.s32.totalorder %s2849_s27, 4   ;;  %s3274_s17 = smov %s2558_s18 }
 0x5b6   : > { %s3275_s18 = smov %s2562_s19  ;;  %s3276_s19 = smov %s2861_s13 }
 0x5b7   : > { %s3277_s20 = smov %s2849_s27  ;;  %30 = sbr.rel (!%p28_p10) target bundleno = 14 (0xe), region = 137 }
 0x5be   :  { %1657 = vsyncpa [#allocation3], 1 }
 0x5bf   :  { %1659 = vsyncpa [#allocation3 + $0x1], 1 }
 0x5c0   :  { %1660 = vsyncpa [#allocation6], 1 }
 0x5c1   :  { %1661 = vsyncpa [#allocation9], 1 }
 0x5c2   :  { %1662 = vsyncpa [#allocation12], 1 }
 0x5c3   :  { %1663 = vsyncpa [#allocation15], 1 }
 0x5c4   :  { %1664 = vsyncpa [#allocation4], 1 }
 0x5c5   :  { %1666 = vsyncpa [#allocation4 + $0x1], 1 }

</bundles_post_ra>
